<compile_context>
chip_gen: v7x
topology: tpu7x:2x2x1
jax: 0.10.0
libtpu: 0.0.40
codegen_flags: <defaults>
</compile_context>

<pallas_src>
from functools import partial

import jax
import jax.numpy as jnp
from jax.experimental import pallas as pl
from jax.experimental.pallas import tpu as pltpu


def rnode_kernel(tau_ref, dt_ref, nsteps_ref, x0_ref, u_ref, wcat_ref, theta_ref, o_ref):
    """One (batch-block, time-chunk) grid step of the Euler rollout.

    tau_ref, dt_ref : SMEM (1, 1) f32 scalars
    nsteps_ref      : SMEM (1, 1) i32, number of valid steps (masks T padding)
    x0_ref          : VMEM (Bblk, Dp)   initial state (read only at chunk 0)
    u_ref           : VMEM (Tc, Bblk, Dp) input chunk
    wcat_ref        : VMEM (Dp, 2*Dp)   [W | in_mat]   (no transpose needed)
    theta_ref       : VMEM (1, Dp)
    o_ref           : VMEM (Bblk, Dp)   state carrier / output; its block index
                      is constant along the time axis, so it stays resident in
                      VMEM across all time chunks of this batch block.
    """
    ti = pl.program_id(1)
    t_chunk = u_ref.shape[0]
    b_blk, d_pad = o_ref.shape

    # Scalar prep (scalar unit, once per grid step): fold tau/dt so the loop
    # body is  x_new = a*x + b*(W @ sigmoid(x+theta) + in_mat @ u).
    dt = dt_ref[0, 0]
    a = 1.0 - dt * (1.0 / tau_ref[0, 0])
    b = dt
    n_valid = nsteps_ref[0, 0]

    @pl.when(ti == 0)
    def _init():
        o_ref[...] = x0_ref[...]

    # Loop invariants, hoisted out of the unrolled time loop.
    theta = jnp.broadcast_to(theta_ref[...], (b_blk, d_pad))
    wcat = wcat_ref[...]                                     # (Dp, 2*Dp)

    def step(i, x):
        u_t = u_ref[i]                                       # (Bblk, Dp)
        s = jax.nn.sigmoid(x + theta)
        cat = jnp.concatenate([s, u_t], axis=1)              # (Bblk, 2*Dp)
        mm = jax.lax.dot_general(                            # == cat @ wcat.T
            cat, wcat, (((1,), (1,)), ((), ())),
            preferred_element_type=jnp.float32,
            precision=jax.lax.Precision.HIGHEST)
        x_new = x * a + mm * b
        valid = (ti * t_chunk + i) < n_valid                 # mask padded steps
        return jnp.where(valid, x_new, x)

    o_ref[...] = jax.lax.fori_loop(0, t_chunk, step, o_ref[...], unroll=True)


def _round_up(n, m):
    return ((n + m - 1) // m) * m


@partial(jax.jit, static_argnames=("t_chunk",))
def rnode_rollout(x0, u_seq, dt, W, in_mat, theta, tau, *, t_chunk=8):
    """Run T forward-Euler RNODE steps in a single Pallas kernel.

    x0:    (B, D) or (D,)      initial state(s)
    u_seq: (T, B, D) or (T, D) one input per step
    Returns the state after T steps, with the same shape as x0.
    """
    x0 = jnp.asarray(x0, jnp.float32)
    u_seq = jnp.asarray(u_seq, jnp.float32)
    squeeze = x0.ndim == 1
    if squeeze:
        x0 = x0[None, :]
        u_seq = u_seq[:, None, :]
    b, d = x0.shape
    t = u_seq.shape[0]

    # Pad: D -> lane multiple (128), B -> sublane multiple (8) / 128-row MXU
    # tile, T -> multiple of the in-kernel chunk (extra steps masked).
    d_pad = _round_up(d, 128)
    b_pad = _round_up(b, 8)
    if b_pad > 128:
        b_blk = 128
        b_pad = _round_up(b, 128)
    else:
        b_blk = b_pad
    t_chunk = max(1, min(t_chunk, t))
    t_pad = _round_up(t, t_chunk)

    x_p = jnp.zeros((b_pad, d_pad), jnp.float32).at[:b, :d].set(x0)
    u_p = jnp.zeros((t_pad, b_pad, d_pad), jnp.float32).at[:t, :b, :d].set(u_seq)
    w_p = jnp.zeros((d_pad, d_pad), jnp.float32).at[:d, :d].set(jnp.asarray(W, jnp.float32))
    i_p = jnp.zeros((d_pad, d_pad), jnp.float32).at[:d, :d].set(jnp.asarray(in_mat, jnp.float32))
    wcat = jnp.concatenate([w_p, i_p], axis=1)               # (Dp, 2*Dp) = [W | in_mat]
    th_p = jnp.zeros((1, d_pad), jnp.float32).at[0, :d].set(jnp.asarray(theta, jnp.float32))
    tau_s = jnp.reshape(jnp.asarray(tau, jnp.float32), (1, 1))
    dt_s = jnp.reshape(jnp.asarray(dt, jnp.float32), (1, 1))
    n_s = jnp.full((1, 1), t, jnp.int32)

    grid = (b_pad // b_blk, t_pad // t_chunk)

    def smem_spec():
        return pl.BlockSpec((1, 1), lambda bi, ti: (0, 0),
                            memory_space=pltpu.MemorySpace.SMEM)

    out = pl.pallas_call(
        rnode_kernel,
        out_shape=jax.ShapeDtypeStruct((b_pad, d_pad), jnp.float32),
        grid=grid,
        in_specs=[
            smem_spec(),                                                    # tau
            smem_spec(),                                                    # dt
            smem_spec(),                                                    # n_steps
            pl.BlockSpec((b_blk, d_pad), lambda bi, ti: (bi, 0)),           # x0
            pl.BlockSpec((t_chunk, b_blk, d_pad), lambda bi, ti: (ti, bi, 0)),  # u chunk
            pl.BlockSpec((d_pad, 2 * d_pad), lambda bi, ti: (0, 0)),        # [W | in_mat]
            pl.BlockSpec((1, d_pad), lambda bi, ti: (0, 0)),                # theta
        ],
        out_specs=pl.BlockSpec((b_blk, d_pad), lambda bi, ti: (bi, 0)),
        input_output_aliases={3: 0},     # in-place state update (x0 buffer -> output)
        compiler_params=pltpu.CompilerParams(
            dimension_semantics=("parallel", "arbitrary"),
            vmem_limit_bytes=32 * 1024 * 1024,
        ),
    )(tau_s, dt_s, n_s, x_p, u_p, wcat, th_p)

    out = out[:b, :d]
    if squeeze:
        out = out[0]
    return out


def rnode_forward(x, u, dt, W, in_mat, theta, tau):
    """Single Euler step == the PyTorch module's forward(x, u, dt)."""
    u_seq = jnp.asarray(u, jnp.float32)[None, ...]
    return rnode_rollout(x, u_seq, dt, W, in_mat, theta, tau)


def rnode_step_ref(x, u, dt, W, in_mat, theta, tau):
    """Pure-JAX reference for one step (row-vector / batched form)."""
    s = jax.nn.sigmoid(x + theta)
    dxdt = -x / tau + s @ W.T + u @ in_mat.T
    return x + dxdt * dt


if __name__ == "__main__":
    jax.config.update("jax_default_matmul_precision", "highest")

    dt = 0.01
    input_dim = 3      # module default
    batch = 4          # batched independent states (padded to 8 sublanes inside)
    T = 10             # Euler steps; exercises time-chunk padding (10 -> 16)

    key = jax.random.PRNGKey(0)
    k_in, k_w, k_th, k_x, k_u = jax.random.split(key, 5)

    # Deterministic parameter init mirroring the PyTorch module's __init__.
    in_mat = jax.random.normal(k_in, (input_dim, input_dim), jnp.float32) * 0.1
    W = jax.random.normal(k_w, (input_dim, input_dim), jnp.float32) * 0.1
    theta = jax.random.normal(k_th, (input_dim,), jnp.float32) * 0.1
    tau = jnp.float32(1.0)

    # Example inputs: a batch of initial states and a T-step input sequence.
    x0 = jax.random.normal(k_x, (batch, input_dim), jnp.float32)
    u_seq = jax.random.normal(k_u, (T, batch, input_dim), jnp.float32)

    # Pallas: the full T-step rollout in one kernel call.
    out = jax.block_until_ready(rnode_rollout(x0, u_seq, dt, W, in_mat, theta, tau))

    # Reference: T sequential applications of the original module's forward.
    ref = x0
    for step_t in range(T):
        ref = rnode_step_ref(ref, u_seq[step_t], dt, W, in_mat, theta, tau)

    assert out.shape == (batch, input_dim)
    assert jnp.allclose(out, ref, atol=1e-4, rtol=1e-4), (out, ref)

    # Single-step vector path matches the PyTorch module's forward() exactly.
    x1 = jax.block_until_ready(rnode_forward(x0[0], u_seq[0, 0], dt, W, in_mat, theta, tau))
    ref1 = rnode_step_ref(x0[0], u_seq[0, 0], dt, W, in_mat, theta, tau)
    assert x1.shape == (input_dim,)
    assert jnp.allclose(x1, ref1, atol=1e-4, rtol=1e-4), (x1, ref1)

    print("KERNEL_OK")
</pallas_src>

<mosaic_0001>
module attributes {stable_mosaic.version = 11 : i64} {
  func.func @rnode_kernel(%arg0: i32, %arg1: i32, %arg2: memref<1x1xf32, #tpu.memory_space<smem>>, %arg3: memref<1x1xf32, #tpu.memory_space<smem>>, %arg4: memref<1x1xi32, #tpu.memory_space<smem>>, %arg5: memref<8x128xf32, #tpu.memory_space<vmem>>, %arg6: memref<8x8x128xf32, #tpu.memory_space<vmem>>, %arg7: memref<128x256xf32, #tpu.memory_space<vmem>>, %arg8: memref<1x128xf32, #tpu.memory_space<vmem>>, %arg9: memref<8x128xf32, #tpu.memory_space<vmem>>) attributes {dimension_semantics = [#tpu.dimension_semantics<parallel>, #tpu.dimension_semantics<arbitrary>], iteration_bounds = array<i64: 1, 2>, scalar_prefetch = 0 : i64, scratch_operands = 0 : i64, tpu.core_type = #tpu.core_type<tc>, window_params = [{transform_indices = @transform_0, window_bounds = array<i64: 1, 1>}, {transform_indices = @transform_1, window_bounds = array<i64: 1, 1>}, {transform_indices = @transform_2, window_bounds = array<i64: 1, 1>}, {transform_indices = @transform_3, window_bounds = array<i64: 8, 128>}, {transform_indices = @transform_4, window_bounds = array<i64: 8, 8, 128>}, {pipeline_mode = #tpu.pipeline_mode<synchronous>, transform_indices = @transform_5, window_bounds = array<i64: 128, 256>}, {pipeline_mode = #tpu.pipeline_mode<synchronous>, transform_indices = @transform_6, window_bounds = array<i64: 1, 128>}, {transform_indices = @transform_7, window_bounds = array<i64: 8, 128>}]} {
    %c0 = arith.constant 0 : index
    %c0_0 = arith.constant 0 : index
    %0 = memref.load %arg3[%c0, %c0_0] : memref<1x1xf32, #tpu.memory_space<smem>>
    %c0_1 = arith.constant 0 : index
    %c0_2 = arith.constant 0 : index
    %1 = memref.load %arg2[%c0_1, %c0_2] : memref<1x1xf32, #tpu.memory_space<smem>>
    %cst = arith.constant 1.000000e+00 : f32
    %2 = arith.divf %cst, %1 : f32
    %3 = arith.mulf %0, %2 : f32
    %cst_3 = arith.constant 1.000000e+00 : f32
    %4 = arith.subf %cst_3, %3 : f32
    %c0_4 = arith.constant 0 : index
    %c0_5 = arith.constant 0 : index
    %5 = memref.load %arg4[%c0_4, %c0_5] : memref<1x1xi32, #tpu.memory_space<smem>>
    %c0_i32 = arith.constant 0 : i32
    %6 = arith.cmpi eq, %arg1, %c0_i32 : i32
    %7 = arith.extui %6 : i1 to i32
    %c0_i32_6 = arith.constant 0 : i32
    %8 = arith.cmpi ne, %7, %c0_i32_6 : i32
    scf.if %8 {
      %c0_56 = arith.constant 0 : index
      %c0_57 = arith.constant 0 : index
      %175 = vector.load %arg5[%c0_56, %c0_57] : memref<8x128xf32, #tpu.memory_space<vmem>>, vector<8x128xf32>
      %c0_58 = arith.constant 0 : index
      %c0_59 = arith.constant 0 : index
      %176 = vector.load %arg9[%c0_58, %c0_59] : memref<8x128xf32, #tpu.memory_space<vmem>>, vector<8x128xf32>
      tpu.vector_store %arg9[%c0_58, %c0_59], %175 {strides = array<i32>} : memref<8x128xf32, #tpu.memory_space<vmem>>, vector<8x128xf32>,
    } else {
    }
    %c0_7 = arith.constant 0 : index
    %c0_8 = arith.constant 0 : index
    %9 = vector.load %arg8[%c0_7, %c0_8] : memref<1x128xf32, #tpu.memory_space<vmem>>, vector<1x128xf32>
    %10 = vector.shape_cast %9 : vector<1x128xf32> to vector<1x128xf32>
    %11 = vector.broadcast %10 : vector<1x128xf32> to vector<8x128xf32>
    %c0_9 = arith.constant 0 : index
    %c0_10 = arith.constant 0 : index
    %12 = vector.load %arg7[%c0_9, %c0_10] : memref<128x256xf32, #tpu.memory_space<vmem>>, vector<128x256xf32>
    %c0_11 = arith.constant 0 : index
    %c0_12 = arith.constant 0 : index
    %13 = vector.load %arg9[%c0_11, %c0_12] : memref<8x128xf32, #tpu.memory_space<vmem>>, vector<8x128xf32>
    %c0_i32_13 = arith.constant 0 : i32
    %14 = arith.index_cast %c0_i32_13 : i32 to index
    %c0_14 = arith.constant 0 : index
    %c0_15 = arith.constant 0 : index
    %15 = vector.load %arg6[%14, %c0_14, %c0_15] : memref<8x8x128xf32, #tpu.memory_space<vmem>>, vector<1x8x128xf32>
    %16 = vector.shape_cast %15 : vector<1x8x128xf32> to vector<8x128xf32>
    %17 = arith.addf %13, %11 : vector<8x128xf32>
    %18 = arith.negf %17 : vector<8x128xf32>
    %19 = math.exp %18 : vector<8x128xf32>
    %cst_16 = arith.constant 1.000000e+00 : f32
    %20 = vector.broadcast %cst_16 : f32 to vector<8x128xf32>
    %21 = arith.addf %20, %19 : vector<8x128xf32>
    %22 = arith.divf %20, %21 : vector<8x128xf32>
    %23 = tpu.concatenate %22, %16 in 1 : vector<8x128xf32>, vector<8x128xf32> -> vector<8x256xf32>
    %cst_17 = arith.constant dense<0.000000e+00> : vector<8x128xf32>
    %24 = tpu.matmul %23, %12, %cst_17 {dimension_numbers = #tpu.dot_dimension_numbers<[1], [1], [0], [0], [0, 0, 1, 0], [], []>, precision = #tpu.contract_precision<fp32>} : vector<8x256xf32>, vector<128x256xf32>, vector<8x128xf32> -> vector<8x128xf32>
    %25 = vector.broadcast %4 : f32 to vector<8x128xf32>
    %26 = arith.mulf %13, %25 : vector<8x128xf32>
    %27 = vector.broadcast %0 : f32 to vector<8x128xf32>
    %28 = arith.mulf %24, %27 : vector<8x128xf32>
    %29 = arith.addf %26, %28 : vector<8x128xf32>
    %c8_i32 = arith.constant 8 : i32
    %30 = arith.muli %arg1, %c8_i32 : i32
    %31 = arith.addi %30, %c0_i32_13 : i32
    %32 = arith.cmpi slt, %31, %5 : i32
    %33 = arith.select %32, %29, %13 : vector<8x128xf32>
    %c1_i32 = arith.constant 1 : i32
    %34 = arith.index_cast %c1_i32 : i32 to index
    %c0_18 = arith.constant 0 : index
    %c0_19 = arith.constant 0 : index
    %35 = vector.load %arg6[%34, %c0_18, %c0_19] : memref<8x8x128xf32, #tpu.memory_space<vmem>>, vector<1x8x128xf32>
    %36 = vector.shape_cast %35 : vector<1x8x128xf32> to vector<8x128xf32>
    %37 = arith.addf %33, %11 : vector<8x128xf32>
    %38 = arith.negf %37 : vector<8x128xf32>
    %39 = math.exp %38 : vector<8x128xf32>
    %cst_20 = arith.constant 1.000000e+00 : f32
    %40 = vector.broadcast %cst_20 : f32 to vector<8x128xf32>
    %41 = arith.addf %40, %39 : vector<8x128xf32>
    %42 = arith.divf %40, %41 : vector<8x128xf32>
    %43 = tpu.concatenate %42, %36 in 1 : vector<8x128xf32>, vector<8x128xf32> -> vector<8x256xf32>
    %cst_21 = arith.constant dense<0.000000e+00> : vector<8x128xf32>
    %44 = tpu.matmul %43, %12, %cst_21 {dimension_numbers = #tpu.dot_dimension_numbers<[1], [1], [0], [0], [0, 0, 1, 0], [], []>, precision = #tpu.contract_precision<fp32>} : vector<8x256xf32>, vector<128x256xf32>, vector<8x128xf32> -> vector<8x128xf32>
    %45 = vector.broadcast %4 : f32 to vector<8x128xf32>
    %46 = arith.mulf %33, %45 : vector<8x128xf32>
    %47 = vector.broadcast %0 : f32 to vector<8x128xf32>
    %48 = arith.mulf %44, %47 : vector<8x128xf32>
    %49 = arith.addf %46, %48 : vector<8x128xf32>
    %c8_i32_22 = arith.constant 8 : i32
    %50 = arith.muli %arg1, %c8_i32_22 : i32
    %51 = arith.addi %50, %c1_i32 : i32
    %52 = arith.cmpi slt, %51, %5 : i32
    %53 = arith.select %52, %49, %33 : vector<8x128xf32>
    %c2_i32 = arith.constant 2 : i32
    %54 = arith.index_cast %c2_i32 : i32 to index
    %c0_23 = arith.constant 0 : index
    %c0_24 = arith.constant 0 : index
    %55 = vector.load %arg6[%54, %c0_23, %c0_24] : memref<8x8x128xf32, #tpu.memory_space<vmem>>, vector<1x8x128xf32>
    %56 = vector.shape_cast %55 : vector<1x8x128xf32> to vector<8x128xf32>
    %57 = arith.addf %53, %11 : vector<8x128xf32>
    %58 = arith.negf %57 : vector<8x128xf32>
    %59 = math.exp %58 : vector<8x128xf32>
    %cst_25 = arith.constant 1.000000e+00 : f32
    %60 = vector.broadcast %cst_25 : f32 to vector<8x128xf32>
    %61 = arith.addf %60, %59 : vector<8x128xf32>
    %62 = arith.divf %60, %61 : vector<8x128xf32>
    %63 = tpu.concatenate %62, %56 in 1 : vector<8x128xf32>, vector<8x128xf32> -> vector<8x256xf32>
    %cst_26 = arith.constant dense<0.000000e+00> : vector<8x128xf32>
    %64 = tpu.matmul %63, %12, %cst_26 {dimension_numbers = #tpu.dot_dimension_numbers<[1], [1], [0], [0], [0, 0, 1, 0], [], []>, precision = #tpu.contract_precision<fp32>} : vector<8x256xf32>, vector<128x256xf32>, vector<8x128xf32> -> vector<8x128xf32>
    %65 = vector.broadcast %4 : f32 to vector<8x128xf32>
    %66 = arith.mulf %53, %65 : vector<8x128xf32>
    %67 = vector.broadcast %0 : f32 to vector<8x128xf32>
    %68 = arith.mulf %64, %67 : vector<8x128xf32>
    %69 = arith.addf %66, %68 : vector<8x128xf32>
    %c8_i32_27 = arith.constant 8 : i32
    %70 = arith.muli %arg1, %c8_i32_27 : i32
    %71 = arith.addi %70, %c2_i32 : i32
    %72 = arith.cmpi slt, %71, %5 : i32
    %73 = arith.select %72, %69, %53 : vector<8x128xf32>
    %c3_i32 = arith.constant 3 : i32
    %74 = arith.index_cast %c3_i32 : i32 to index
    %c0_28 = arith.constant 0 : index
    %c0_29 = arith.constant 0 : index
    %75 = vector.load %arg6[%74, %c0_28, %c0_29] : memref<8x8x128xf32, #tpu.memory_space<vmem>>, vector<1x8x128xf32>
    %76 = vector.shape_cast %75 : vector<1x8x128xf32> to vector<8x128xf32>
    %77 = arith.addf %73, %11 : vector<8x128xf32>
    %78 = arith.negf %77 : vector<8x128xf32>
    %79 = math.exp %78 : vector<8x128xf32>
    %cst_30 = arith.constant 1.000000e+00 : f32
    %80 = vector.broadcast %cst_30 : f32 to vector<8x128xf32>
    %81 = arith.addf %80, %79 : vector<8x128xf32>
    %82 = arith.divf %80, %81 : vector<8x128xf32>
    %83 = tpu.concatenate %82, %76 in 1 : vector<8x128xf32>, vector<8x128xf32> -> vector<8x256xf32>
    %cst_31 = arith.constant dense<0.000000e+00> : vector<8x128xf32>
    %84 = tpu.matmul %83, %12, %cst_31 {dimension_numbers = #tpu.dot_dimension_numbers<[1], [1], [0], [0], [0, 0, 1, 0], [], []>, precision = #tpu.contract_precision<fp32>} : vector<8x256xf32>, vector<128x256xf32>, vector<8x128xf32> -> vector<8x128xf32>
    %85 = vector.broadcast %4 : f32 to vector<8x128xf32>
    %86 = arith.mulf %73, %85 : vector<8x128xf32>
    %87 = vector.broadcast %0 : f32 to vector<8x128xf32>
    %88 = arith.mulf %84, %87 : vector<8x128xf32>
    %89 = arith.addf %86, %88 : vector<8x128xf32>
    %c8_i32_32 = arith.constant 8 : i32
    %90 = arith.muli %arg1, %c8_i32_32 : i32
    %91 = arith.addi %90, %c3_i32 : i32
    %92 = arith.cmpi slt, %91, %5 : i32
    %93 = arith.select %92, %89, %73 : vector<8x128xf32>
    %c4_i32 = arith.constant 4 : i32
    %94 = arith.index_cast %c4_i32 : i32 to index
    %c0_33 = arith.constant 0 : index
    %c0_34 = arith.constant 0 : index
    %95 = vector.load %arg6[%94, %c0_33, %c0_34] : memref<8x8x128xf32, #tpu.memory_space<vmem>>, vector<1x8x128xf32>
    %96 = vector.shape_cast %95 : vector<1x8x128xf32> to vector<8x128xf32>
    %97 = arith.addf %93, %11 : vector<8x128xf32>
    %98 = arith.negf %97 : vector<8x128xf32>
    %99 = math.exp %98 : vector<8x128xf32>
    %cst_35 = arith.constant 1.000000e+00 : f32
    %100 = vector.broadcast %cst_35 : f32 to vector<8x128xf32>
    %101 = arith.addf %100, %99 : vector<8x128xf32>
    %102 = arith.divf %100, %101 : vector<8x128xf32>
    %103 = tpu.concatenate %102, %96 in 1 : vector<8x128xf32>, vector<8x128xf32> -> vector<8x256xf32>
    %cst_36 = arith.constant dense<0.000000e+00> : vector<8x128xf32>
    %104 = tpu.matmul %103, %12, %cst_36 {dimension_numbers = #tpu.dot_dimension_numbers<[1], [1], [0], [0], [0, 0, 1, 0], [], []>, precision = #tpu.contract_precision<fp32>} : vector<8x256xf32>, vector<128x256xf32>, vector<8x128xf32> -> vector<8x128xf32>
    %105 = vector.broadcast %4 : f32 to vector<8x128xf32>
    %106 = arith.mulf %93, %105 : vector<8x128xf32>
    %107 = vector.broadcast %0 : f32 to vector<8x128xf32>
    %108 = arith.mulf %104, %107 : vector<8x128xf32>
    %109 = arith.addf %106, %108 : vector<8x128xf32>
    %c8_i32_37 = arith.constant 8 : i32
    %110 = arith.muli %arg1, %c8_i32_37 : i32
    %111 = arith.addi %110, %c4_i32 : i32
    %112 = arith.cmpi slt, %111, %5 : i32
    %113 = arith.select %112, %109, %93 : vector<8x128xf32>
    %c5_i32 = arith.constant 5 : i32
    %114 = arith.index_cast %c5_i32 : i32 to index
    %c0_38 = arith.constant 0 : index
    %c0_39 = arith.constant 0 : index
    %115 = vector.load %arg6[%114, %c0_38, %c0_39] : memref<8x8x128xf32, #tpu.memory_space<vmem>>, vector<1x8x128xf32>
    %116 = vector.shape_cast %115 : vector<1x8x128xf32> to vector<8x128xf32>
    %117 = arith.addf %113, %11 : vector<8x128xf32>
    %118 = arith.negf %117 : vector<8x128xf32>
    %119 = math.exp %118 : vector<8x128xf32>
    %cst_40 = arith.constant 1.000000e+00 : f32
    %120 = vector.broadcast %cst_40 : f32 to vector<8x128xf32>
    %121 = arith.addf %120, %119 : vector<8x128xf32>
    %122 = arith.divf %120, %121 : vector<8x128xf32>
    %123 = tpu.concatenate %122, %116 in 1 : vector<8x128xf32>, vector<8x128xf32> -> vector<8x256xf32>
    %cst_41 = arith.constant dense<0.000000e+00> : vector<8x128xf32>
    %124 = tpu.matmul %123, %12, %cst_41 {dimension_numbers = #tpu.dot_dimension_numbers<[1], [1], [0], [0], [0, 0, 1, 0], [], []>, precision = #tpu.contract_precision<fp32>} : vector<8x256xf32>, vector<128x256xf32>, vector<8x128xf32> -> vector<8x128xf32>
    %125 = vector.broadcast %4 : f32 to vector<8x128xf32>
    %126 = arith.mulf %113, %125 : vector<8x128xf32>
    %127 = vector.broadcast %0 : f32 to vector<8x128xf32>
    %128 = arith.mulf %124, %127 : vector<8x128xf32>
    %129 = arith.addf %126, %128 : vector<8x128xf32>
    %c8_i32_42 = arith.constant 8 : i32
    %130 = arith.muli %arg1, %c8_i32_42 : i32
    %131 = arith.addi %130, %c5_i32 : i32
    %132 = arith.cmpi slt, %131, %5 : i32
    %133 = arith.select %132, %129, %113 : vector<8x128xf32>
    %c6_i32 = arith.constant 6 : i32
    %134 = arith.index_cast %c6_i32 : i32 to index
    %c0_43 = arith.constant 0 : index
    %c0_44 = arith.constant 0 : index
    %135 = vector.load %arg6[%134, %c0_43, %c0_44] : memref<8x8x128xf32, #tpu.memory_space<vmem>>, vector<1x8x128xf32>
    %136 = vector.shape_cast %135 : vector<1x8x128xf32> to vector<8x128xf32>
    %137 = arith.addf %133, %11 : vector<8x128xf32>
    %138 = arith.negf %137 : vector<8x128xf32>
    %139 = math.exp %138 : vector<8x128xf32>
    %cst_45 = arith.constant 1.000000e+00 : f32
    %140 = vector.broadcast %cst_45 : f32 to vector<8x128xf32>
    %141 = arith.addf %140, %139 : vector<8x128xf32>
    %142 = arith.divf %140, %141 : vector<8x128xf32>
    %143 = tpu.concatenate %142, %136 in 1 : vector<8x128xf32>, vector<8x128xf32> -> vector<8x256xf32>
    %cst_46 = arith.constant dense<0.000000e+00> : vector<8x128xf32>
    %144 = tpu.matmul %143, %12, %cst_46 {dimension_numbers = #tpu.dot_dimension_numbers<[1], [1], [0], [0], [0, 0, 1, 0], [], []>, precision = #tpu.contract_precision<fp32>} : vector<8x256xf32>, vector<128x256xf32>, vector<8x128xf32> -> vector<8x128xf32>
    %145 = vector.broadcast %4 : f32 to vector<8x128xf32>
    %146 = arith.mulf %133, %145 : vector<8x128xf32>
    %147 = vector.broadcast %0 : f32 to vector<8x128xf32>
    %148 = arith.mulf %144, %147 : vector<8x128xf32>
    %149 = arith.addf %146, %148 : vector<8x128xf32>
    %c8_i32_47 = arith.constant 8 : i32
    %150 = arith.muli %arg1, %c8_i32_47 : i32
    %151 = arith.addi %150, %c6_i32 : i32
    %152 = arith.cmpi slt, %151, %5 : i32
    %153 = arith.select %152, %149, %133 : vector<8x128xf32>
    %c7_i32 = arith.constant 7 : i32
    %154 = arith.index_cast %c7_i32 : i32 to index
    %c0_48 = arith.constant 0 : index
    %c0_49 = arith.constant 0 : index
    %155 = vector.load %arg6[%154, %c0_48, %c0_49] : memref<8x8x128xf32, #tpu.memory_space<vmem>>, vector<1x8x128xf32>
    %156 = vector.shape_cast %155 : vector<1x8x128xf32> to vector<8x128xf32>
    %157 = arith.addf %153, %11 : vector<8x128xf32>
    %158 = arith.negf %157 : vector<8x128xf32>
    %159 = math.exp %158 : vector<8x128xf32>
    %cst_50 = arith.constant 1.000000e+00 : f32
    %160 = vector.broadcast %cst_50 : f32 to vector<8x128xf32>
    %161 = arith.addf %160, %159 : vector<8x128xf32>
    %162 = arith.divf %160, %161 : vector<8x128xf32>
    %163 = tpu.concatenate %162, %156 in 1 : vector<8x128xf32>, vector<8x128xf32> -> vector<8x256xf32>
    %cst_51 = arith.constant dense<0.000000e+00> : vector<8x128xf32>
    %164 = tpu.matmul %163, %12, %cst_51 {dimension_numbers = #tpu.dot_dimension_numbers<[1], [1], [0], [0], [0, 0, 1, 0], [], []>, precision = #tpu.contract_precision<fp32>} : vector<8x256xf32>, vector<128x256xf32>, vector<8x128xf32> -> vector<8x128xf32>
    %165 = vector.broadcast %4 : f32 to vector<8x128xf32>
    %166 = arith.mulf %153, %165 : vector<8x128xf32>
    %167 = vector.broadcast %0 : f32 to vector<8x128xf32>
    %168 = arith.mulf %164, %167 : vector<8x128xf32>
    %169 = arith.addf %166, %168 : vector<8x128xf32>
    %c8_i32_52 = arith.constant 8 : i32
    %170 = arith.muli %arg1, %c8_i32_52 : i32
    %171 = arith.addi %170, %c7_i32 : i32
    %172 = arith.cmpi slt, %171, %5 : i32
    %173 = arith.select %172, %169, %153 : vector<8x128xf32>
    %c8_i32_53 = arith.constant 8 : i32
    %c0_54 = arith.constant 0 : index
    %c0_55 = arith.constant 0 : index
    %174 = vector.load %arg9[%c0_54, %c0_55] : memref<8x128xf32, #tpu.memory_space<vmem>>, vector<8x128xf32>
    tpu.vector_store %arg9[%c0_54, %c0_55], %173 {strides = array<i32>} : memref<8x128xf32, #tpu.memory_space<vmem>>, vector<8x128xf32>,
    return
  }
  func.func @transform_0(%arg0: i32, %arg1: i32) -> (i32, i32) {
    %c0_i32 = arith.constant 0 : i32
    %c0_i32_0 = arith.constant 0 : i32
    %c0_i32_1 = arith.constant 0 : i32
    return %c0_i32, %c0_i32_0 : i32, i32
  }
  func.func @transform_1(%arg0: i32, %arg1: i32) -> (i32, i32) {
    %c0_i32 = arith.constant 0 : i32
    %c0_i32_0 = arith.constant 0 : i32
    %c0_i32_1 = arith.constant 0 : i32
    return %c0_i32, %c0_i32_0 : i32, i32
  }
  func.func @transform_2(%arg0: i32, %arg1: i32) -> (i32, i32) {
    %c0_i32 = arith.constant 0 : i32
    %c0_i32_0 = arith.constant 0 : i32
    %c0_i32_1 = arith.constant 0 : i32
    return %c0_i32, %c0_i32_0 : i32, i32
  }
  func.func @transform_3(%arg0: i32, %arg1: i32) -> (i32, i32) {
    %c0_i32 = arith.constant 0 : i32
    %c0_i32_0 = arith.constant 0 : i32
    return %arg0, %c0_i32 : i32, i32
  }
  func.func @transform_4(%arg0: i32, %arg1: i32) -> (i32, i32, i32) {
    %c0_i32 = arith.constant 0 : i32
    %c0_i32_0 = arith.constant 0 : i32
    return %arg1, %arg0, %c0_i32 : i32, i32, i32
  }
  func.func @transform_5(%arg0: i32, %arg1: i32) -> (i32, i32) {
    %c0_i32 = arith.constant 0 : i32
    %c0_i32_0 = arith.constant 0 : i32
    %c0_i32_1 = arith.constant 0 : i32
    return %c0_i32, %c0_i32_0 : i32, i32
  }
  func.func @transform_6(%arg0: i32, %arg1: i32) -> (i32, i32) {
    %c0_i32 = arith.constant 0 : i32
    %c0_i32_0 = arith.constant 0 : i32
    %c0_i32_1 = arith.constant 0 : i32
    return %c0_i32, %c0_i32_0 : i32, i32
  }
  func.func @transform_7(%arg0: i32, %arg1: i32) -> (i32, i32) {
    %c0_i32 = arith.constant 0 : i32
    %c0_i32_0 = arith.constant 0 : i32
    return %arg0, %c0_i32 : i32, i32
  }
}

</mosaic_0001>

<bundles_post_ra>
// kernel: rnode_rollout.1
= control target key start
LH: loop header
LB: loop body
LE: loop exit
PB: predicated region body
PF: predicated region fallthrough
CT: control target
= control target key end

     0   :  { %s9274_s30 = smov 0   ;;  %s9276_s8 = smov 0   ;;  %s11125_s0 = inlined_call_operand.<no memory space> [shape: f32[1,1], index: 0, kind: input, shape index: {}]   ;;  %s11126_s1 = inlined_call_operand.<no memory space> [shape: f32[1,1], index: 1, kind: input, shape index: {}]   ;;  %s11127_s2 = inlined_call_operand.<no memory space> [shape: s32[1,1], index: 2, kind: input, shape index: {}]   ;;  %s11128_s3 = inlined_call_operand.vmem [shape: f32[8,128], index: 3, kind: input, shape index: {}, may-alias: {3,7}]   ;;  %s11129_s4 = inlined_call_operand.vmem [shape: f32[16,8,128], index: 4, kind: input, shape index: {}]   ;;  %s11130_s5 = inlined_call_operand.vmem [shape: f32[128,256], index: 5, kind: input, shape index: {}]   ;;  %s11131_s6 = inlined_call_operand.vmem [shape: f32[1,128], index: 6, kind: input, shape index: {}]   ;;  %s11132_s7 = inlined_call_operand.vmem [shape: f32[8,128], index: 7, kind: output, shape index: {}, may-alias: {3,7}]  }
   0x1   :  { %12 = sst [smem:[#allocation2]] %s11125_s0  ;;  %s9278_s9 = smov 0  }
   0x2   :  { %13 = sst [smem:[#allocation3]] %s11126_s1 }
   0x3   :  { %14 = sst [smem:[#allocation4]] %s11127_s2 }
   0x4 LB: > { %s29_s0 = sadd.s32 1, %s9219_s8  ;;  %p7499_p0 = scmp.ge.s32.totalorder %s9223_s9, 1  ;;  %s9223_s9 = sphi %s9278_s9, %s20_s9   ;;  %s9219_s8 = sphi %s9276_s8, %s11625_s8   ;;  %s9215_s30 = sphi %s9274_s30, %s11624_s30  }
   0x5   : > { %p30_p1 = scmp.ge.s32.totalorder %s29_s0, 2  ;;  %p267_p2 = scmp.lt.s32.totalorder %s9223_s9, 3 }
   0x7   : > { %s11627_s0 = smov (%p30_p1, %s29_s0), 0  ;;  %p268_p3 = pnand %p7499_p0, %p267_p2 }
   0x9   : > { %271 = sbr.rel (%p268_p3) target bundleno = 4719 (0x126f), region = 48 }
  0x10   : > { %s9292_s1 = sshll.u32 %s9215_s30, 3  ;;  %s323_s2 = sld [smem:[#allocation2]] }
  0x11   : > { %p310_p4 = scmp.lt.s32.totalorder %s9292_s1, 15  ;;  %s9295_s10 = sld [smem:[#allocation4]] }
  0x12   : > { %s9303_s16 = sld [smem:[#allocation3]]  ;;  %p7502_p5 = scmp.ne.s32.totalorder %s9215_s30, 0 }
  0x13   : > { %s311_s11 = scalar_select %p310_p4, %s9292_s1, 15 }
  0x14   : > { %v334_v2 = vld [vmem:[%s11128_s3] sm:$0xff] (!%p7502_p5) }
  0x15   : > { %s7501_s12 = sshll.u32 %s311_s11, 3  ;;  %335 = vst [vmem:[%s11132_s7] sm:$0xff] (!%p7502_p5), %v334_v2 }
  0x16   : > { %s9301_s15 = scalar_lea.vmem %s11129_s4, %s7501_s12  ;;  %v324_v0 = vstv %s323_s2 }
  0x17   : > { %9165 = vrcp.f32 %v324_v0 }
  0x21   : > { %v9166_v1 = vpop.eup %9165 }
  0x22   : > { %9139 = vpush %v9166_v1 }
  0x50   : > { %333 = sbr.rel (%p7502_p5) target bundleno = 87 (0x57), region = 52 }
  0x53   : > { %s9140_s17 = spop %9139 }
  0x54   : > { %s327_s18 = smul.f32 %s9140_s17, %s9303_s16 }
  0x56   : > { %s9306_s19 = ssub.f32 1.0, %s327_s18 }
  0x57 PF: > { %v9317_v3 = vld [vmem:[%s11130_s5 + $0x8] sm:$0xff]  ;;  %v9322_v4 = vld [vmem:[%s11130_s5 + $0x18] sm:$0xff]  ;;  %v9327_v5 = vld [vmem:[%s11130_s5] sm:$0xff]  ;;  %p1252_p6 = scmp.lt.s32.totalorder %s9292_s1, %s9295_s10  ;;  %s3011_s23 = sadd.s32 2, %s9292_s1 }
  0x58   : > { %v384_v6 = vand.u32 4294901760, %v9317_v3  ;;  %v388_v7 = vand.u32 4294901760, %v9322_v4  ;;  %v9334_v8 = vld [vmem:[%s11130_s5 + $0x10] sm:$0xff]  ;;  %v386_v9 = vand.u32 4294901760, %v9327_v5  ;;  %v9340_v10 = vld [vmem:[%s11130_s5 + $0x28] sm:$0xff]  ;;  %v9345_v11 = vld [vmem:[%s11130_s5 + $0x38] sm:$0xff]  ;;  %p3012_p8 = scmp.lt.s32.totalorder %s3011_s23, %s9295_s10 }
  0x59   : > { %v390_v12 = vand.u32 4294901760, %v9334_v8  ;;  %v392_v13 = vand.u32 4294901760, %v9340_v10  ;;  %v396_v14 = vand.u32 4294901760, %v9345_v11  ;;  %v9359_v16 = vld [vmem:[%s11130_s5 + $0x20] sm:$0xff]  ;;  %v9364_v17 = vld [vmem:[%s11130_s5 + $0x30] sm:$0xff]  ;;  %v9381_v20 = vld [vmem:[%s11130_s5 + $0x48] sm:$0xff] }
  0x5a   : > { %v9354_v15 = vpack.c.bf16 %v388_v7, %v384_v6  ;;  %v9386_v21 = vld [vmem:[%s11130_s5 + $0x58] sm:$0xff]  ;;  %v11149_v22 = vand.u32 4294901760, %v9359_v16  ;;  %v11148_v23 = vand.u32 4294901760, %v9364_v17  ;;  %v11147_v24 = vand.u32 4294901760, %v9381_v20  ;;  %v9407_v27 = vld [vmem:[%s11130_s5 + $0x40] sm:$0xff]  ;;  %v9419_v30 = vld [vmem:[%s11130_s5 + $0x50] sm:$0xff] }
  0x5b   : > { %v9370_v18 = vpack.c.bf16 %v390_v12, %v386_v9  ;;  %v9376_v19 = vpack.c.bf16 %v396_v14, %v392_v13  ;;  %v11146_v25 = vand.u32 4294901760, %v9386_v21  ;;  %v376_v28 = vld [vmem:[%s9301_s15] sm:$0xff]  ;;  %v9434_v33 = vld [vmem:[%s11130_s5 + $0x68] sm:$0xff]  ;;  %v9439_v34 = vld [vmem:[%s11130_s5 + $0x78] sm:$0xff]  ;;  %v11145_v36 = vand.u32 4294901760, %v9407_v27  ;;  %s3891_s25 = sadd.s32 3, %s9292_s1 }
  0x5c   : > { %11324 = vst [vmem:[#allocation5_spill] sm:$0xff] %v9354_v15  ;;  %7524 = vmatprep.subr.bf16.mxu0 %v9354_v15  ;;  %7716 = vmatprep.subr.bf16.mxu1 %v9354_v15  ;;  %v9402_v26 = vpack.c.bf16 %v11148_v23, %v11149_v22  ;;  %v9424_v31 = vld [vmem:[%s11131_s6] ss:$0 sm:$0xff]  ;;  %v9441_v35 = vand.u32 4294901760, %v376_v28  ;;  %v11144_v37 = vand.u32 4294901760, %v9419_v30  ;;  %v11143_v40 = vand.u32 4294901760, %v9434_v33  ;;  %p3892_p9 = scmp.lt.s32.totalorder %s3891_s25, %s9295_s10 }
  0x5d   : > { %11325 = vst [vmem:[#allocation6_spill] sm:$0xff] %v9370_v18  ;;  %11326 = vst [vmem:[#allocation7_spill] sm:$0xff] %v9376_v19  ;;  %7526 = vmatpush1.bf16.xpose.msra.mxu0 %v9370_v18  ;;  %7718 = vmatpush1.bf16.xpose.msra.mxu1 %v9370_v18  ;;  %v9414_v29 = vpack.c.bf16 %v11146_v25, %v11147_v24  ;;  %v9429_v32 = vld [vmem:[%s11132_s7] sm:$0xff]  ;;  %v11142_v41 = vand.u32 4294901760, %v9439_v34  ;;  %v9480_v48 = vld [vmem:[%s11130_s5 + $0x70] sm:$0xff]  ;;  %v9628_v24 = vsub.f32 %v9327_v5, %v386_v9  ;;  %s4771_s27 = sadd.s32 4, %s9292_s1 }
  0x5e   : > { %7528 = vmatprep.subr.bf16.mxu0 %v9376_v19  ;;  %7720 = vmatprep.subr.bf16.mxu1 %v9376_v19  ;;  %11327 = vst [vmem:[#allocation8_spill] sm:$0xff] %v9402_v26  ;;  %11329 = vst [vmem:[#allocation10_spill] sm:$0xff] %v9424_v31  ;;  %v9447_v38 = vsub.f32 %v376_v28, %v9441_v35  ;;  %v377_v39 = vadd.f32 %v9424_v31, %v9429_v32  ;;  %v9475_v47 = vld [vmem:[%s11130_s5 + $0x60] sm:$0xff]  ;;  %v9485_v49 = vld [vmem:[%s11130_s5 + $0x88] sm:$0xff]  ;;  %v11140_v53 = vand.u32 4294901760, %v9480_v48  ;;  %p4772_p10 = scmp.lt.s32.totalorder %s4771_s27, %s9295_s10  ;;  %s5651_s29 = sadd.s32 5, %s9292_s1 }
  0x5f   : > { %11328 = vst [vmem:[#allocation9_spill] sm:$0xff] %v9414_v29  ;;  %11330 = vst [vmem:[#allocation11_spill] sm:$0xff] %v9429_v32  ;;  %v9461_v44 = vpack.c.bf16 %v11144_v37, %v11145_v36  ;;  %v9470_v46 = vpack.c.bf16 %v11142_v41, %v11143_v40  ;;  %v9490_v50 = vld [vmem:[%s11130_s5 + $0x98] sm:$0xff]  ;;  %v11141_v52 = vand.u32 4294901760, %v9475_v47  ;;  %v11139_v54 = vand.u32 4294901760, %v9485_v49  ;;  %v9515_v58 = vld [vmem:[%s11130_s5 + $0x80] sm:$0xff]  ;;  %p5652_p11 = scmp.lt.s32.totalorder %s5651_s29, %s9295_s10 }
  0x60   : > { %v11133_v42 = vand.u32 4294901760, %v9447_v38  ;;  %v7504_v43 = vmul.f32 -1.442695, %v377_v39  ;;  %v11138_v55 = vand.u32 4294901760, %v9490_v50  ;;  %v9520_v59 = vld [vmem:[%s11130_s5 + $0x90] sm:$0xff]  ;;  %v9525_v61 = vld [vmem:[%s11130_s5 + $0xa8] sm:$0xff]  ;;  %v9633_v23 = vsub.f32 %v9334_v8, %v390_v12 }
  0x61   : > { %11331 = vst [vmem:[#allocation12_spill] sm:$0xff] %v9461_v44  ;;  %11332 = vst [vmem:[#allocation13_spill] sm:$0xff] %v9470_v46  ;;  %v9504_v56 = vpack.c.bf16 %v11140_v53, %v11141_v52  ;;  %v9530_v62 = vld [vmem:[%s11130_s5 + $0xb8] sm:$0xff]  ;;  %v11137_v63 = vand.u32 4294901760, %v9515_v58  ;;  %v11136_v0 = vand.u32 4294901760, %v9520_v59  ;;  %v11135_v2 = vand.u32 4294901760, %v9525_v61 }
  0x62   : > { %v483_v45 = vsub.f32 %v9447_v38, %v11133_v42  ;;  %9167 = vpow2.f32 %v7504_v43  ;;  %v9510_v57 = vpack.c.bf16 %v11138_v55, %v11139_v54  ;;  %v11134_v28 = vand.u32 4294901760, %v9530_v62  ;;  %v9549_v43 = vld [vmem:[%s11130_s5 + $0xa0] sm:$0xff]  ;;  %v9570_v42 = vld [vmem:[%s11130_s5 + $0xd8] sm:$0xff]  ;;  %v9621_v37 = vld [vmem:[%s11130_s5 + $0xf0] sm:$0xff]  ;;  %11339 = vst [vmem:[#allocation20_spill] sm:$0xff] %v9628_v24  ;;  %s6531_s12 = sadd.s32 6, %s9292_s1 }
  0x63   : > { %11333 = vst [vmem:[#allocation14_spill] sm:$0xff] %v9504_v56  ;;  %v9544_v39 = vpack.c.bf16 %v11136_v0, %v11137_v63  ;;  %v9590_v0 = vld [vmem:[%s11130_s5 + $0xf8] sm:$0xff]  ;;  %v9595_v63 = vsub.f32 %v9317_v3, %v384_v6  ;;  %v9600_v55 = vsub.f32 %v9322_v4, %v388_v7  ;;  %v426_v54 = vand.u32 4294901760, %v9549_v43  ;;  %v9616_v7 = vld [vmem:[%s11130_s5 + $0xe0] sm:$0xff]  ;;  %s1253_s20 = scalar_select %p1252_p6, 1, 0 }
  0x64   : > { %v484_v51 = vand.u32 4294901760, %v483_v45  ;;  %11334 = vst [vmem:[#allocation15_spill] sm:$0xff] %v9510_v57  ;;  %v9554_v45 = vld [vmem:[%s11130_s5 + $0xb0] sm:$0xff]  ;;  %v436_v41 = vand.u32 4294901760, %v9570_v42  ;;  %v444_v4 = vand.u32 4294901760, %v9590_v0  ;;  %v9639_v22 = vsub.f32 %v9340_v10, %v392_v13  ;;  %p6532_p12 = scmp.lt.s32.totalorder %s6531_s12, %s9295_s10 }
  0x65   : > { %7530 = vmatpush1.bf16.xpose.msra.mxu0 %v9402_v26  ;;  %7722 = vmatpush1.bf16.xpose.msra.mxu1 %v9402_v26  ;;  %11335 = vst [vmem:[#allocation16_spill] sm:$0xff] %v9544_v39  ;;  %11337 = vst [vmem:[#allocation18_spill] sm:$0xff] %v9595_v63  ;;  %v430_v53 = vand.u32 4294901760, %v9554_v45  ;;  %v9644_v25 = vsub.f32 %v9345_v11, %v396_v14  ;;  %v11346_v10 = vand.u32 4294901760, %v9595_v63  ;;  %v11347_v11 = vand.u32 4294901760, %v9600_v55 }
  0x66   : > { %7532 = vmatprep.subr.bf16.mxu0 %v9414_v29  ;;  %7724 = vmatprep.subr.bf16.mxu1 %v9414_v29  ;;  %11338 = vst [vmem:[#allocation19_spill] sm:$0xff] %v9600_v55  ;;  %11340 = vst [vmem:[#allocation21_spill] sm:$0xff] %v9639_v22  ;;  %v11348_v31 = vand.u32 4294901760, %v9359_v16  ;;  %v11385_v29 = vand.u32 4294901760, %v9628_v24  ;;  %v11386_v19 = vand.u32 4294901760, %v9633_v23 }
  0x67   : > { %485 = vmatprep.mubr.f32.mxu0 %v484_v51  ;;  %v9560_v51 = vpack.c.bf16 %v11134_v28, %v11135_v2  ;;  %v9580_v28 = vld [vmem:[%s11130_s5 + $0xd0] sm:$0xff]  ;;  %v9585_v2 = vld [vmem:[%s11130_s5 + $0xe8] sm:$0xff]  ;;  %11341 = vst [vmem:[#allocation22_spill] sm:$0xff] %v9644_v25  ;;  %v9646_v36 = vpack.c.bf16 %v430_v53, %v426_v54  ;;  %v9659_v13 = vsub.f32 %v9595_v63, %v11346_v10  ;;  %v11349_v10 = vand.u32 4294901760, %v9364_v17  ;;  %s3013_s24 = scalar_select %p3012_p8, 1, 0 }
  0x68   : > { %v438_v6 = vand.u32 4294901760, %v9580_v28  ;;  %v440_v40 = vand.u32 4294901760, %v9585_v2  ;;  %v9664_v14 = vsub.f32 %v9600_v55, %v11347_v11  ;;  %v11350_v11 = vand.u32 4294901760, %v9381_v20  ;;  %s3893_s26 = scalar_select %p3892_p9, 1, 0 }
  0x69   : > { %11336 = vst [vmem:[#allocation17_spill] sm:$0xff] %v9560_v51  ;;  %11342 = vst [vmem:[#allocation23_spill] sm:$0xff] %v9646_v36  ;;  %v505_v26 = vsub.f32 %v9628_v24, %v11385_v29  ;;  %v517_v18 = vsub.f32 %v9633_v23, %v11386_v19  ;;  %s4773_s28 = scalar_select %p4772_p10, 1, 0 }
  0x6a   : > { %v9652_v8 = vpack.c.bf16 %v444_v4, %v440_v40  ;;  %s5653_s30 = scalar_select %p5652_p11, 1, 0 }
  0x6b   : > { %v506_v29 = vand.u32 4294901760, %v505_v26  ;;  %s6533_s13 = scalar_select %p6532_p12, 1, 0 }
  0x6c   : > { %v9168_v60 = vpop.eup %9167  ;;  %11345 = vst [vmem:[#allocation26_spill] sm:$0xff] %v9652_v8 }
  0x6d   : > { %7534 = vmatpush1.bf16.xpose.msra.mxu0 %v9461_v44  ;;  %7726 = vmatpush1.bf16.xpose.msra.mxu1 %v9461_v44  ;;  %v381_v1 = vadd.f32 1.0, %v9168_v60  ;;  %v9565_v60 = vld [vmem:[%s11130_s5 + $0xc8] sm:$0xff] }
  0x6e   : > { %7536 = vmatprep.subr.bf16.mxu0 %v9470_v46  ;;  %7728 = vmatprep.subr.bf16.mxu1 %v9470_v46  ;;  %v432_v52 = vand.u32 4294901760, %v9565_v60  ;;  %v9678_v46 = vsub.f32 %v9364_v17, %v11349_v10  ;;  %v11353_v17 = vand.u32 4294901760, %v9419_v30 }
  0x6f   : > { %9169 = vrcp.f32 %v381_v1  ;;  %v9575_v1 = vld [vmem:[%s11130_s5 + $0xc0] sm:$0xff] }
  0x70   : > { %v434_v3 = vand.u32 4294901760, %v9575_v1  ;;  %v9648_v5 = vpack.c.bf16 %v436_v41, %v432_v52  ;;  %v9699_v10 = vsub.f32 %v9419_v30, %v11353_v17  ;;  %v11357_v30 = vand.u32 4294901760, %v9480_v48 }
  0x72   : > { %11343 = vst [vmem:[#allocation24_spill] sm:$0xff] %v9648_v5  ;;  %v9650_v9 = vpack.c.bf16 %v438_v6, %v434_v3  ;;  %v9723_v17 = vsub.f32 %v9480_v48, %v11357_v30  ;;  %v11361_v48 = vand.u32 4294901760, %v9520_v59 }
  0x74   : > { %11344 = vst [vmem:[#allocation25_spill] sm:$0xff] %v9650_v9  ;;  %v9744_v30 = vsub.f32 %v9520_v59, %v11361_v48  ;;  %v9766_v59 = vsub.f32 %v9570_v42, %v436_v41  ;;  %v9786_v41 = vsub.f32 %v9585_v2, %v440_v40  ;;  %v9790_v42 = vpack.c.bf16 %v9644_v25, %v9639_v22 }
  0x75   : > { %7538 = vmatpush1.bf16.xpose.msra.mxu0 %v9504_v56  ;;  %7730 = vmatpush1.bf16.xpose.msra.mxu1 %v9504_v56  ;;  %v9673_v56 = vsub.f32 %v9359_v16, %v11348_v31  ;;  %v11352_v16 = vand.u32 4294901760, %v9407_v27 }
  0x76   : > { %7540 = vmatprep.subr.bf16.mxu0 %v9510_v57  ;;  %7732 = vmatprep.subr.bf16.mxu1 %v9510_v57  ;;  %v11351_v57 = vand.u32 4294901760, %v9386_v21  ;;  %11366 = vst [vmem:[#allocation29_spill] sm:$0xff] %v9790_v42 }
  0x77   : > { %v9694_v31 = vsub.f32 %v9407_v27, %v11352_v16  ;;  %v11356_v27 = vand.u32 4294901760, %v9475_v47  ;;  %v11188_v19 = vand.u32 4294901760, %v9673_v56 }
  0x78   : > { %v9689_v12 = vsub.f32 %v9386_v21, %v11351_v57  ;;  %v11355_v21 = vand.u32 4294901760, %v9439_v34 }
  0x79   : > { %v9170_v32 = vpop.eup %9169  ;;  %v9717_v16 = vsub.f32 %v9475_v47, %v11356_v27  ;;  %v11360_v47 = vand.u32 4294901760, %v9515_v58  ;;  %v9810_v2 = vpack.c.bf16 %v9699_v10, %v9694_v31 }
  0x7a   : > { %v9712_v57 = vsub.f32 %v9439_v34, %v11355_v21  ;;  %v11359_v34 = vand.u32 4294901760, %v9490_v50 }
  0x7b   : > { %v9738_v27 = vsub.f32 %v9515_v58, %v11360_v47  ;;  %v9757_v58 = vsub.f32 %v9549_v43, %v426_v54  ;;  %v9760_v47 = vsub.f32 %v9554_v45, %v430_v53  ;;  %v9779_v54 = vsub.f32 %v9580_v28, %v438_v6  ;;  %11370 = vst [vmem:[#allocation32_spill] sm:$0xff] %v9810_v2 }
  0x7c   : > { %v9733_v21 = vsub.f32 %v9490_v50, %v11359_v34  ;;  %v11363_v50 = vand.u32 4294901760, %v9530_v62  ;;  %v9801_v28 = vsub.f32 %v9590_v0, %v444_v4  ;;  %v11369_v43 = vand.u32 4294901760, %v9616_v7 }
  0x7d   : > { %7542 = vmatpush1.bf16.xpose.msra.mxu0 %v9544_v39  ;;  %7734 = vmatpush1.bf16.xpose.msra.mxu1 %v9544_v39  ;;  %v9684_v39 = vsub.f32 %v9381_v20, %v11350_v11  ;;  %v11354_v20 = vand.u32 4294901760, %v9434_v33  ;;  %v9832_v6 = vpack.c.bf16 %v9744_v30, %v9738_v27  ;;  %v500_v4 = vand.u32 4294901760, %v9659_v13 }
  0x7e   : > { %7544 = vmatprep.subr.bf16.mxu0 %v9560_v51  ;;  %7736 = vmatprep.subr.bf16.mxu1 %v9560_v51  ;;  %v9702_v51 = vand.u32 4294901760, %v9170_v32  ;;  %v9754_v34 = vsub.f32 %v9530_v62, %v11363_v50  ;;  %v9776_v62 = vsub.f32 %v9575_v1, %v434_v3  ;;  %v9806_v40 = vsub.f32 %v9616_v7, %v11369_v43 }
  0x7f   : > { %v9707_v11 = vsub.f32 %v9434_v33, %v11354_v20  ;;  %v11358_v33 = vand.u32 4294901760, %v9485_v49  ;;  %v9798_v53 = vpack.c.bf16 %v9689_v12, %v9684_v39  ;;  %v9824_v1 = vpack.c.bf16 %v9723_v17, %v9717_v16  ;;  %11375 = vst [vmem:[#allocation36_spill] sm:$0xff] %v9832_v6 }
  0x80   : > { %v9773_v48 = vsub.f32 %v9170_v32, %v9702_v51  ;;  %v9794_v32 = vpack.c.bf16 %v9678_v46, %v9673_v56  ;;  %v9843_v43 = vpack.c.bf16 %v9760_v47, %v9757_v58  ;;  %v9856_v13 = vpack.c.bf16 %v9801_v28, %v9786_v41 }
  0x81   : > { %v9728_v20 = vsub.f32 %v9485_v49, %v11358_v33  ;;  %v11362_v49 = vand.u32 4294901760, %v9525_v61  ;;  %11368 = vst [vmem:[#allocation31_spill] sm:$0xff] %v9798_v53  ;;  %v9814_v45 = vpack.c.bf16 %v9712_v57, %v9707_v11  ;;  %11373 = vst [vmem:[#allocation34_spill] sm:$0xff] %v9824_v1 }
  0x82   : > { %11367 = vst [vmem:[#allocation30_spill] sm:$0xff] %v9794_v32  ;;  %11377 = vst [vmem:[#allocation38_spill] sm:$0xff] %v9843_v43 }
  0x83   : > { %v9749_v33 = vsub.f32 %v9525_v61, %v11362_v49  ;;  %v9770_v61 = vpack.c.bf16 %v9600_v55, %v9595_v63  ;;  %11371 = vst [vmem:[#allocation33_spill] sm:$0xff] %v9814_v45  ;;  %v9828_v3 = vpack.c.bf16 %v9733_v21, %v9728_v20  ;;  %v512_v49 = vand.u32 4294901760, %v9664_v14  ;;  %11380 = vst [vmem:[#allocation41_spill] sm:$0xff] %v9856_v13 }
  0x84   : > { %v9852_v55 = vpack.c.bf16 %v9779_v54, %v9776_v62 }
  0x85   : > { %7546 = vmatpush1.bf16.xpose.msra.mxu0 %v9646_v36  ;;  %7738 = vmatpush1.bf16.xpose.msra.mxu1 %v9646_v36  ;;  %11364 = vst [vmem:[#allocation27_spill] sm:$0xff] %v9770_v61  ;;  %11374 = vst [vmem:[#allocation35_spill] sm:$0xff] %v9828_v3  ;;  %v9839_v50 = vpack.c.bf16 %v9754_v34, %v9749_v33  ;;  %v11383_v36 = vand.u32 4294901760, %v9621_v37  ;;  %v9876_v15 = vpack.c.bf16 %v512_v49, %v500_v4 }
  0x86   : > { %7548 = vmatprep.subr.bf16.mxu0 %v9648_v5  ;;  %7740 = vmatprep.subr.bf16.mxu1 %v9648_v5  ;;  %v9763_v5 = vsub.f32 %v9565_v60, %v432_v52  ;;  %v9783_v52 = vpack.c.bf16 %v9633_v23, %v9628_v24  ;;  %v11372_v60 = vand.u32 4294901760, %v9621_v37  ;;  %11379 = vst [vmem:[#allocation40_spill] sm:$0xff] %v9852_v55  ;;  %v518_v24 = vand.u32 4294901760, %v517_v18 }
  0x87   : > { %11376 = vst [vmem:[#allocation37_spill] sm:$0xff] %v9839_v50  ;;  %11387 = vst [vmem:[#allocation44_spill] sm:$0xff] %v9876_v15  ;;  %v11192_v4 = vand.u32 4294901760, %v9678_v46  ;;  %v529_v18 = vsub.f32 %v9673_v56, %v11188_v19  ;;  %v11194_v19 = vand.u32 4294901760, %v9694_v31 }
  0x88   : > { %11365 = vst [vmem:[#allocation28_spill] sm:$0xff] %v9783_v52  ;;  %v9820_v0 = vsub.f32 %v9621_v37, %v11372_v60  ;;  %v9848_v60 = vpack.c.bf16 %v9766_v59, %v9763_v5 }
  0x89   : > { %v541_v26 = vsub.f32 %v9678_v46, %v11192_v4  ;;  %v11201_v4 = vand.u32 4294901760, %v9712_v57 }
  0x8a   : > { %11378 = vst [vmem:[#allocation39_spill] sm:$0xff] %v9848_v60  ;;  %v9860_v14 = vpack.c.bf16 %v9820_v0, %v9806_v40 }
  0x8c   : > { %11381 = vst [vmem:[#allocation42_spill] sm:$0xff] %v9860_v14 }
  0x8d   : > { %7550 = vmatpush1.bf16.xpose.msra.mxu0 %v9650_v9  ;;  %7742 = vmatpush1.bf16.xpose.msra.mxu1 %v9650_v9  ;;  %v11382_v9 = vand.u32 4294901760, %v9616_v7  ;;  %v11389_v7 = vand.u32 4294901760, %v9644_v25 }
  0x8e   : > { %7552 = vmatprep.subr.bf16.mxu0 %v9652_v8  ;;  %7744 = vmatprep.subr.bf16.mxu1 %v9652_v8  ;;  %v11388_v8 = vand.u32 4294901760, %v9639_v22 }
  0x8f   : > { %v9868_v44 = vpack.c.bf16 %v11383_v36, %v11382_v9  ;;  %v535_v37 = vsub.f32 %v9644_v25, %v11389_v7  ;;  %v11390_v36 = vand.u32 4294901760, %v9773_v48  ;;  %v11193_v7 = vand.u32 4294901760, %v9689_v12 }
  0x90   : > { %v523_v63 = vsub.f32 %v9639_v22, %v11388_v8  ;;  %v11191_v22 = vand.u32 4294901760, %v9684_v39  ;;  %v9895_v25 = vpack.c.bf16 %v518_v24, %v506_v29  ;;  %v530_v24 = vand.u32 4294901760, %v529_v18 }
  0x91   : > { %11384 = vst [vmem:[#allocation43_spill] sm:$0xff] %v9868_v44  ;;  %v489_v9 = vsub.f32 %v9773_v48, %v11390_v36  ;;  %v536_v8 = vand.u32 4294901760, %v535_v37  ;;  %v542_v29 = vand.u32 4294901760, %v541_v26 }
  0x92   : > { %v524_v49 = vand.u32 4294901760, %v523_v63  ;;  %11391 = vst [vmem:[#allocation45_spill] sm:$0xff] %v9895_v25  ;;  %v547_v37 = vsub.f32 %v9684_v39, %v11191_v22  ;;  %v11198_v22 = vand.u32 4294901760, %v9707_v11 }
  0x93   : > { %v490_v36 = vand.u32 4294901760, %v489_v9  ;;  %v559_v9 = vsub.f32 %v9689_v12, %v11193_v7  ;;  %v9918_v7 = vpack.c.bf16 %v542_v29, %v530_v24 }
  0x94   : > { %v9903_v63 = vpack.c.bf16 %v536_v8, %v524_v49  ;;  %v548_v49 = vand.u32 4294901760, %v547_v37  ;;  %v571_v37 = vsub.f32 %v9707_v11, %v11198_v22  ;;  %v11209_v22 = vand.u32 4294901760, %v9733_v21 }
  0x95   : > { %7554 = vmatpush1.bf16.xpose.msra.mxu0 %v9868_v44  ;;  %7746 = vmatpush1.bf16.xpose.msra.mxu1 %v9868_v44  ;;  %v560_v8 = vand.u32 4294901760, %v559_v9  ;;  %11393 = vst [vmem:[#allocation47_spill] sm:$0xff] %v9918_v7  ;;  %v583_v9 = vsub.f32 %v9712_v57, %v11201_v4 }
  0x96   : > { %7556 = vmatprep.subr.bf16.mxu0 %v9876_v15  ;;  %7748 = vmatprep.subr.bf16.mxu1 %v9876_v15  ;;  %11392 = vst [vmem:[#allocation46_spill] sm:$0xff] %v9903_v63  ;;  %v11197_v15 = vand.u32 4294901760, %v9699_v10 }
  0x97   : > { %v9926_v26 = vpack.c.bf16 %v560_v8, %v548_v49  ;;  %v572_v49 = vand.u32 4294901760, %v571_v37  ;;  %v584_v8 = vand.u32 4294901760, %v583_v9  ;;  %v607_v9 = vsub.f32 %v9733_v21, %v11209_v22 }
  0x98   : > { %v565_v18 = vsub.f32 %v9699_v10, %v11197_v15  ;;  %v11206_v15 = vand.u32 4294901760, %v9728_v20 }
  0x99   : > { %11394 = vst [vmem:[#allocation48_spill] sm:$0xff] %v9926_v26 }
  0x9a   : > { %v566_v29 = vand.u32 4294901760, %v565_v18  ;;  %v9948_v18 = vpack.c.bf16 %v584_v8, %v572_v49  ;;  %v595_v37 = vsub.f32 %v9728_v20, %v11206_v15  ;;  %v608_v8 = vand.u32 4294901760, %v607_v9 }
  0x9b   : > { %v11217_v15 = vand.u32 4294901760, %v9754_v34 }
  0x9c   : > { %491 = vmatmul.mubr.f32.vlgmr.msra.gmra.mrb[0].mxu0 %v490_v36  ;;  %v553_v36 = vsub.f32 %v9694_v31, %v11194_v19  ;;  %v11202_v19 = vand.u32 4294901760, %v9717_v16  ;;  %11396 = vst [vmem:[#allocation50_spill] sm:$0xff] %v9948_v18  ;;  %v596_v49 = vand.u32 4294901760, %v595_v37 }
  0x9d   : > { %7558 = vmatpush1.bf16.xpose.msra.mxu0 %v9895_v25  ;;  %721 = vmatprep.mubr.f32.mxu0 %v9441_v35  ;;  %v631_v9 = vsub.f32 %v9754_v34, %v11217_v15 }
  0x9e   : > { %7560 = vmatprep.subr.bf16.mxu0 %v9903_v63  ;;  %v554_v24 = vand.u32 4294901760, %v553_v36  ;;  %v11205_v63 = vand.u32 4294901760, %v9723_v17  ;;  %v577_v4 = vsub.f32 %v9717_v16, %v11202_v19  ;;  %v11210_v19 = vand.u32 4294901760, %v9738_v27 }
  0xa0   : > { %v9940_v25 = vpack.c.bf16 %v566_v29, %v554_v24  ;;  %v589_v36 = vsub.f32 %v9723_v17, %v11205_v63  ;;  %v578_v24 = vand.u32 4294901760, %v577_v4  ;;  %v11214_v63 = vand.u32 4294901760, %v9749_v33 }
  0xa1   : > { %v601_v22 = vsub.f32 %v9738_v27, %v11210_v19  ;;  %v11218_v19 = vand.u32 4294901760, %v9757_v58 }
  0xa2   : > { %11395 = vst [vmem:[#allocation49_spill] sm:$0xff] %v9940_v25  ;;  %v590_v29 = vand.u32 4294901760, %v589_v36  ;;  %v9970_v36 = vpack.c.bf16 %v608_v8, %v596_v49  ;;  %v619_v37 = vsub.f32 %v9749_v33, %v11214_v63  ;;  %v632_v8 = vand.u32 4294901760, %v631_v9 }
  0xa3   : > { %v11225_v63 = vand.u32 4294901760, %v9766_v59  ;;  %v625_v15 = vsub.f32 %v9757_v58, %v11218_v19  ;;  %v11226_v19 = vand.u32 4294901760, %v9776_v62 }
  0xa4   : > { %11398 = vst [vmem:[#allocation52_spill] sm:$0xff] %v9970_v36  ;;  %v620_v49 = vand.u32 4294901760, %v619_v37 }
  0xa5   : > { %7562 = vmatpush1.bf16.xpose.msra.mxu0 %v9918_v7  ;;  %v9962_v7 = vpack.c.bf16 %v590_v29, %v578_v24  ;;  %v602_v24 = vand.u32 4294901760, %v601_v22  ;;  %v655_v9 = vsub.f32 %v9766_v59, %v11225_v63  ;;  %v649_v63 = vsub.f32 %v9776_v62, %v11226_v19 }
  0xa6   : > { %7564 = vmatprep.subr.bf16.mxu0 %v9926_v26  ;;  %v11213_v26 = vand.u32 4294901760, %v9744_v30  ;;  %v11235_v19 = vand.u32 4294901760, %v9806_v40 }
  0xa7   : > { %11397 = vst [vmem:[#allocation51_spill] sm:$0xff] %v9962_v7 }
  0xa8   : > { %v613_v4 = vsub.f32 %v9744_v30, %v11213_v26  ;;  %v11222_v26 = vand.u32 4294901760, %v9763_v5 }
  0xaa   : > { %v614_v29 = vand.u32 4294901760, %v613_v4  ;;  %v9992_v4 = vpack.c.bf16 %v632_v8, %v620_v49  ;;  %v643_v37 = vsub.f32 %v9763_v5, %v11222_v26  ;;  %v656_v8 = vand.u32 4294901760, %v655_v9 }
  0xab   : > { %v11231_v26 = vand.u32 4294901760, %v9801_v28 }
  0xac   : > { %11399 = vst [vmem:[#allocation53_spill] sm:$0xff] %v9992_v4  ;;  %v644_v49 = vand.u32 4294901760, %v643_v37 }
  0xad   : > { %7566 = vmatpush1.bf16.xpose.msra.mxu0 %v9940_v25  ;;  %v9984_v25 = vpack.c.bf16 %v614_v29, %v602_v24  ;;  %v626_v24 = vand.u32 4294901760, %v625_v15  ;;  %v679_v9 = vsub.f32 %v9801_v28, %v11231_v26 }
  0xae   : > { %7568 = vmatprep.subr.bf16.mxu0 %v9948_v18  ;;  %v11221_v18 = vand.u32 4294901760, %v9760_v47 }
  0xb0   : > { %v637_v22 = vsub.f32 %v9760_v47, %v11221_v18  ;;  %v11230_v18 = vand.u32 4294901760, %v9786_v41 }
  0xb2   : > { %v638_v29 = vand.u32 4294901760, %v637_v22  ;;  %v10014_v22 = vpack.c.bf16 %v656_v8, %v644_v49  ;;  %v667_v37 = vsub.f32 %v9786_v41, %v11230_v18  ;;  %v680_v8 = vand.u32 4294901760, %v679_v9  ;;  %v11407_v9 = vld [vmem:[#allocation7_spill] sm:$0xff] }
  0xb3   : > { %v673_v18 = vsub.f32 %v9806_v40, %v11235_v19  ;;  %v11414_v19 = vld [vmem:[#allocation16_spill] sm:$0xff] }
  0xb4   : > { %v668_v49 = vand.u32 4294901760, %v667_v37 }
  0xb5   : > { %7570 = vmatpush1.bf16.xpose.msra.mxu0 %v9962_v7  ;;  %v10006_v7 = vpack.c.bf16 %v638_v29, %v626_v24  ;;  %v650_v24 = vand.u32 4294901760, %v649_v63 }
  0xb6   : > { %7572 = vmatprep.subr.bf16.mxu0 %v9970_v36  ;;  %v11229_v36 = vand.u32 4294901760, %v9779_v54  ;;  %v10034_v63 = vpack.c.bf16 %v680_v8, %v668_v49  ;;  %v11410_v49 = vld [vmem:[#allocation12_spill] sm:$0xff]  ;;  %v11411_v8 = vld [vmem:[#allocation13_spill] sm:$0xff] }
  0xb7   : > { %11400 = vst [vmem:[#allocation54_spill] sm:$0xff] %v10006_v7 }
  0xb8   : > { %v661_v15 = vsub.f32 %v9779_v54, %v11229_v36  ;;  %11402 = vst [vmem:[#allocation56_spill] sm:$0xff] %v10034_v63 }
  0xba   : > { %v662_v29 = vand.u32 4294901760, %v661_v15  ;;  %v674_v15 = vand.u32 4294901760, %v673_v18  ;;  %v11406_v18 = vand.u32 4294901760, %v9447_v38 }
  0xbc   : > { %v10026_v36 = vpack.c.bf16 %v662_v29, %v650_v24  ;;  %v11408_v24 = vld [vmem:[#allocation8_spill] sm:$0xff]  ;;  %v11409_v29 = vld [vmem:[#allocation9_spill] sm:$0xff] }
  0xbd   : > { %7574 = vmatpush1.bf16.xpose.msra.mxu0 %v9984_v25 }
  0xbe   : > { %7576 = vmatprep.subr.bf16.mxu0 %v9992_v4  ;;  %v11234_v4 = vand.u32 4294901760, %v9820_v0  ;;  %11401 = vst [vmem:[#allocation55_spill] sm:$0xff] %v10026_v36 }
  0xc0   : > { %v685_v26 = vsub.f32 %v9820_v0, %v11234_v4  ;;  %v11413_v4 = vld [vmem:[#allocation15_spill] sm:$0xff] }
  0xc5   : > { %7578 = vmatpush1.bf16.xpose.msra.mxu0 %v10006_v7  ;;  %v686_v7 = vand.u32 4294901760, %v685_v26  ;;  %v11405_v26 = vld [vmem:[#allocation6_spill] sm:$0xff] }
  0xc6   : > { %7580 = vmatprep.subr.bf16.mxu0 %v10014_v22 }
  0xc7   : > { %v10038_v37 = vpack.c.bf16 %v686_v7, %v674_v15  ;;  %v11404_v7 = vld [vmem:[#allocation5_spill] sm:$0xff]  ;;  %v11412_v15 = vld [vmem:[#allocation14_spill] sm:$0xff] }
  0xc9   : > { %11403 = vst [vmem:[#allocation57_spill] sm:$0xff] %v10038_v37 }
  0xcd   : > { %7582 = vmatpush1.bf16.xpose.msra.mxu0 %v10026_v36 }
  0xce   : > { %7584 = vmatprep.subr.bf16.mxu0 %v10034_v63 }
  0xd5   : > { %7586 = vmatpush1.bf16.xpose.msra.mxu0 %v10038_v37 }
  0xd6   : > { %7588 = vmatprep.subr.bf16.mxu0 %v9770_v61 }
  0xdc   : > { %723 = vmatmul.mubr.f32.vlgmr.msra.gmra.mrb[0].mxu0 %v9702_v51 }
  0xdd   : > { %7590 = vmatpush1.bf16.xpose.msra.mxu0 %v9783_v52  ;;  %858 = vmatprep.mubr.f32.mxu0 %v9447_v38  ;;  %v11416_v38 = vld [vmem:[#allocation23_spill] sm:$0xff]  ;;  %v11431_v52 = vld [vmem:[#allocation22_spill] sm:$0xff] }
  0xde   : > { %7592 = vmatprep.subr.bf16.mxu0 %v9790_v42  ;;  %v11432_v61 = vand.u32 4294901760, %v11431_v52 }
  0xe5   : > { %7594 = vmatpush1.bf16.xpose.msra.mxu0 %v9794_v32  ;;  %v11429_v32 = vld [vmem:[#allocation21_spill] sm:$0xff] }
  0xe6   : > { %7596 = vmatprep.subr.bf16.mxu0 %v9798_v53  ;;  %v11430_v42 = vand.u32 4294901760, %v11429_v32  ;;  %v11438_v32 = vand.u32 4294901760, %v9684_v39  ;;  %v11447_v39 = vand.u32 4294901760, %v9717_v16  ;;  %v11456_v16 = vand.u32 4294901760, %v9749_v33 }
  0xe7   : > { %v11465_v33 = vand.u32 4294901760, %v9776_v62 }
  0xe8   : > { %v10095_v37 = vpack.c.bf16 %v11432_v61, %v11430_v42  ;;  %v11439_v61 = vand.u32 4294901760, %v9689_v12  ;;  %v11442_v42 = vand.u32 4294901760, %v9699_v10  ;;  %v11448_v12 = vand.u32 4294901760, %v9723_v17 }
  0xe9   : > { %v11451_v10 = vand.u32 4294901760, %v9733_v21  ;;  %v11457_v17 = vand.u32 4294901760, %v9754_v34  ;;  %v11460_v21 = vand.u32 4294901760, %v9760_v47  ;;  %v11466_v34 = vand.u32 4294901760, %v9779_v54 }
  0xea   : > { %11433 = vst [vmem:[#allocation7_spill] sm:$0xff] %v10095_v37  ;;  %v10112_v52 = vpack.c.bf16 %v11439_v61, %v11438_v32  ;;  %v11469_v47 = vand.u32 4294901760, %v9801_v28 }
  0xeb   : > { %v10176_v61 = vpack.c.bf16 %v11466_v34, %v11465_v33 }
  0xec   : > { %11440 = vst [vmem:[#allocation9_spill] sm:$0xff] %v10112_v52 }
  0xed   : > { %7598 = vmatpush1.bf16.xpose.msra.mxu0 %v9810_v2  ;;  %v11427_v2 = vand.u32 4294901760, %v9633_v23  ;;  %v11436_v23 = vand.u32 4294901760, %v9678_v46  ;;  %v11444_v46 = vand.u32 4294901760, %v9707_v11  ;;  %v11453_v11 = vand.u32 4294901760, %v9738_v27 }
  0xee   : > { %7600 = vmatprep.subr.bf16.mxu0 %v9814_v45  ;;  %v11462_v27 = vand.u32 4294901760, %v9763_v5  ;;  %v11471_v5 = vand.u32 4294901760, %v9806_v40 }
  0xf5   : > { %7602 = vmatpush1.bf16.xpose.msra.mxu0 %v9824_v1  ;;  %v11425_v1 = vld [vmem:[#allocation20_spill] sm:$0xff] }
  0xf6   : > { %7604 = vmatprep.subr.bf16.mxu0 %v9828_v3  ;;  %v11426_v45 = vand.u32 4294901760, %v11425_v1  ;;  %v11435_v1 = vand.u32 4294901760, %v9673_v56  ;;  %v11445_v56 = vand.u32 4294901760, %v9712_v57  ;;  %v11454_v57 = vand.u32 4294901760, %v9744_v30 }
  0xf7   : > { %v11463_v30 = vand.u32 4294901760, %v9766_v59  ;;  %v11472_v59 = vand.u32 4294901760, %v9820_v0  ;;  %v10242_v0 = vstv %s9306_s19 }
  0xf8   : > { %v10089_v53 = vpack.c.bf16 %v11427_v2, %v11426_v45  ;;  %v10106_v2 = vpack.c.bf16 %v11436_v23, %v11435_v1  ;;  %v10154_v1 = vpack.c.bf16 %v11457_v17, %v11456_v16  ;;  %11475 = vst [vmem:[#allocation20_spill] sm:$0xff] %v10242_v0  ;;  %v11477_v17 = vld [vmem:[#allocation10_spill] sm:$0xff] }
  0xf9   : > { %v10168_v32 = vpack.c.bf16 %v11463_v30, %v11462_v27 }
  0xfa   : > { %11428 = vst [vmem:[#allocation6_spill] sm:$0xff] %v10089_v53  ;;  %11437 = vst [vmem:[#allocation8_spill] sm:$0xff] %v10106_v2 }
  0xfd   : > { %7606 = vmatpush1.bf16.xpose.msra.mxu0 %v9832_v6 }
  0xfe   : > { %7608 = vmatprep.subr.bf16.mxu0 %v9839_v50  ;;  %v11422_v50 = vld [vmem:[#allocation19_spill] sm:$0xff] }
  0xff   : > { %v11423_v6 = vand.u32 4294901760, %v11422_v50  ;;  %v11434_v50 = vand.u32 4294901760, %v9773_v48 }
 0x105   : > { %7610 = vmatpush1.bf16.xpose.msra.mxu0 %v9843_v43 }
 0x106   : > { %7612 = vmatprep.subr.bf16.mxu0 %v9848_v60  ;;  %v11420_v60 = vld [vmem:[#allocation18_spill] sm:$0xff] }
 0x107   : > { %v11421_v43 = vand.u32 4294901760, %v11420_v60 }
 0x109   : > { %v10081_v3 = vpack.c.bf16 %v11423_v6, %v11421_v43  ;;  %v10126_v6 = vpack.c.bf16 %v11445_v56, %v11444_v46  ;;  %v10134_v43 = vpack.c.bf16 %v11448_v12, %v11447_v39  ;;  %v10245_v46 = vstv %s9303_s16  ;;  %v11476_v56 = vld [vmem:[#allocation11_spill] sm:$0xff]  ;;  %s2131_s16 = sadd.s32 1, %s9292_s1 }
 0x10a   : > { %v1247_v39 = vmul.f32 %v10242_v0, %v11476_v56  ;;  %v1254_v12 = vstv %s1253_s20  ;;  %p2132_p7 = scmp.lt.s32.totalorder %s2131_s16, %s9295_s10 }
 0x10b   : > { %11424 = vst [vmem:[#allocation5_spill] sm:$0xff] %v10081_v3  ;;  %11446 = vst [vmem:[#allocation13_spill] sm:$0xff] %v10126_v6  ;;  %vm1255_vm0 = vcmp.eq.s32.totalorder %v1254_v12, 1  ;;  %v11483_v12 = vld [vmem:[#allocation50_spill] sm:$0xff] }
 0x10c   : > { %11449 = vst [vmem:[#allocation14_spill] sm:$0xff] %v10134_v43  ;;  %s2133_s19 = scalar_select %p2132_p7, 1, 0 }
 0x10d   : > { %7614 = vmatpush1.bf16.xpose.msra.mxu0 %v9852_v55  ;;  %v11419_v55 = vld [vmem:[#allocation26_spill] sm:$0xff] }
 0x10e   : > { %7616 = vmatprep.subr.bf16.mxu0 %v9856_v13  ;;  %v11418_v13 = vld [vmem:[#allocation25_spill] sm:$0xff] }
 0x10f   : > { %11467 = vst [vmem:[#allocation25_spill] sm:$0xff] %v10176_v61 }
 0x115   : > { %7618 = vmatpush1.bf16.xpose.msra.mxu0 %v9860_v14  ;;  %v11415_v14 = vld [vmem:[#allocation17_spill] sm:$0xff] }
 0x116   : > { %7620 = vmatprep.subr.bf16.mxu0 %v11404_v7  ;;  %11458 = vst [vmem:[#allocation17_spill] sm:$0xff] %v10154_v1 }
 0x11c   : > { %861 = vmatmul.mubr.f32.vlgmr.msra.gmra.mrb[0].mxu0 %v9773_v48  ;;  %v11441_v48 = vand.u32 4294901760, %v9694_v31  ;;  %v11450_v31 = vand.u32 4294901760, %v9728_v20  ;;  %v11459_v20 = vand.u32 4294901760, %v9757_v58  ;;  %v11468_v58 = vand.u32 4294901760, %v9786_v41 }
 0x11d   : > { %7622 = vmatpush1.bf16.xpose.msra.mxu0 %v11405_v26  ;;  %965 = vmatprep.mubr.f32.mxu0 %v11406_v18  ;;  %v11417_v18 = vld [vmem:[#allocation24_spill] sm:$0xff] }
 0x11e   : > { %7624 = vmatprep.subr.bf16.mxu0 %v11407_v9  ;;  %v10120_v45 = vpack.c.bf16 %v11442_v42, %v11441_v48  ;;  %v10140_v60 = vpack.c.bf16 %v11451_v10, %v11450_v31  ;;  %v10162_v23 = vpack.c.bf16 %v11460_v21, %v11459_v20  ;;  %11464 = vst [vmem:[#allocation24_spill] sm:$0xff] %v10168_v32 }
 0x11f   : > { %v10182_v48 = vpack.c.bf16 %v11469_v47, %v11468_v58  ;;  %v10190_v42 = vpack.c.bf16 %v11472_v59, %v11471_v5 }
 0x120   : > { %11443 = vst [vmem:[#allocation12_spill] sm:$0xff] %v10120_v45  ;;  %11452 = vst [vmem:[#allocation15_spill] sm:$0xff] %v10140_v60 }
 0x121   : > { %11461 = vst [vmem:[#allocation23_spill] sm:$0xff] %v10162_v23  ;;  %11470 = vst [vmem:[#allocation18_spill] sm:$0xff] %v10182_v48 }
 0x122   : > { %11473 = vst [vmem:[#allocation19_spill] sm:$0xff] %v10190_v42 }
 0x125   : > { %7626 = vmatpush1.bf16.xpose.msra.mxu0 %v11408_v24 }
 0x126   : > { %7628 = vmatprep.subr.bf16.mxu0 %v11409_v29 }
 0x12d   : > { %7630 = vmatpush1.bf16.xpose.msra.mxu0 %v11410_v49 }
 0x12e   : > { %7632 = vmatprep.subr.bf16.mxu0 %v11411_v8 }
 0x135   : > { %7634 = vmatpush1.bf16.xpose.msra.mxu0 %v11412_v15 }
 0x136   : > { %7636 = vmatprep.subr.bf16.mxu0 %v11413_v4 }
 0x13d   : > { %7638 = vmatpush1.bf16.xpose.msra.mxu0 %v11414_v19 }
 0x13e   : > { %7640 = vmatprep.subr.bf16.mxu0 %v11415_v14 }
 0x145   : > { %7642 = vmatpush1.bf16.xpose.msra.mxu0 %v11416_v38 }
 0x146   : > { %7644 = vmatprep.subr.bf16.mxu0 %v11417_v18 }
 0x14d   : > { %7646 = vmatpush1.bf16.xpose.msra.mxu0 %v11418_v13 }
 0x14e   : > { %7648 = vmatprep.subr.bf16.mxu0 %v11419_v55 }
 0x155   : > { %7650 = vmatpush1.bf16.xpose.msra.mxu0 %v9868_v44 }
 0x156   : > { %7652 = vmatprep.subr.bf16.mxu0 %v10081_v3 }
 0x15c   : > { %969 = vmatmul.mubr.f32.vlgmr.msra.gmra.mrb[0].mxu0 %v11434_v50  ;;  %v10148_v50 = vpack.c.bf16 %v11454_v57, %v11453_v11 }
 0x15d   : > { %7654 = vmatpush1.bf16.xpose.msra.mxu0 %v10089_v53  ;;  %1135 = vmatprep.mubr.f32.mxu0 %v9441_v35 }
 0x15e   : > { %7656 = vmatprep.subr.bf16.mxu0 %v10095_v37  ;;  %11455 = vst [vmem:[#allocation16_spill] sm:$0xff] %v10148_v50 }
 0x165   : > { %7658 = vmatpush1.bf16.xpose.msra.mxu0 %v10106_v2 }
 0x166   : > { %7660 = vmatprep.subr.bf16.mxu0 %v10112_v52 }
 0x16d   : > { %7662 = vmatpush1.bf16.xpose.msra.mxu0 %v10120_v45 }
 0x16e   : > { %7664 = vmatprep.subr.bf16.mxu0 %v10126_v6 }
 0x175   : > { %7666 = vmatpush1.bf16.xpose.msra.mxu0 %v10134_v43 }
 0x176   : > { %7668 = vmatprep.subr.bf16.mxu0 %v10140_v60 }
 0x17d   : > { %7670 = vmatpush1.bf16.xpose.msra.mxu0 %v10148_v50 }
 0x17e   : > { %7672 = vmatprep.subr.bf16.mxu0 %v10154_v1 }
 0x185   : > { %7674 = vmatpush1.bf16.xpose.msra.mxu0 %v10162_v23 }
 0x186   : > { %7676 = vmatprep.subr.bf16.mxu0 %v10168_v32 }
 0x18d   : > { %7678 = vmatpush1.bf16.xpose.msra.mxu0 %v10176_v61 }
 0x18e   : > { %7680 = vmatprep.subr.bf16.mxu0 %v10182_v48 }
 0x195   : > { %7682 = vmatpush1.bf16.xpose.msra.mxu0 %v10190_v42 }
 0x196   : > { %7684 = vmatprep.subr.bf16.mxu0 %v11404_v7 }
 0x19c   : > { %1137 = vmatmul.mubr.f32.vlgmr.msra.gmra.mrb[0].mxu0 %v9702_v51 }
 0x19d   : > { %7686 = vmatpush1.bf16.xpose.msra.mxu0 %v11405_v26  ;;  %1239 = vmatprep.mubr.f32.mxu0 %v9441_v35  ;;  %v11474_v35 = vld [vmem:[#allocation44_spill] sm:$0xff] }
 0x19e   : > { %7688 = vmatprep.subr.bf16.mxu0 %v11407_v9 }
 0x1a5   : > { %7690 = vmatpush1.bf16.xpose.msra.mxu0 %v11408_v24 }
 0x1a6   : > { %7692 = vmatprep.subr.bf16.mxu0 %v11409_v29 }
 0x1ad   : > { %7694 = vmatpush1.bf16.xpose.msra.mxu0 %v11410_v49 }
 0x1ae   : > { %7696 = vmatprep.subr.bf16.mxu0 %v11411_v8 }
 0x1b5   : > { %7698 = vmatpush1.bf16.xpose.msra.mxu0 %v11412_v15 }
 0x1b6   : > { %7700 = vmatprep.subr.bf16.mxu0 %v11413_v4 }
 0x1bd   : > { %7702 = vmatpush1.bf16.xpose.msra.mxu0 %v11414_v19 }
 0x1be   : > { %7704 = vmatprep.subr.bf16.mxu0 %v11415_v14 }
 0x1c5   : > { %7706 = vmatpush1.bf16.xpose.msra.mxu0 %v11416_v38 }
 0x1c6   : > { %7708 = vmatprep.subr.bf16.mxu0 %v11417_v18 }
 0x1cd   : > { %7710 = vmatpush1.bf16.xpose.msra.mxu0 %v11418_v13 }
 0x1ce   : > { %7712 = vmatprep.subr.bf16.mxu0 %v11419_v55 }
 0x1d5   : > { %7714 = vmatpush1.bf16.xpose.msra.mxu0 %v9868_v44 }
 0x1d6   : > { %7908 = vmatprep.subr.bf16.mxu0 %v11404_v7 }
 0x1dc   : > { %1241 = vmatmul.mubr.f32.vlgmr.msra.gmra.mrb[0].mxu0 %v9702_v51  ;;  %v7506_v51 = vld [vmem:[%s9301_s15 + $0x8] sm:$0xff] }
 0x1dd   : > { %7910 = vmatpush1.bf16.xpose.msra.mxu0 %v11405_v26  ;;  %v10230_v62 = vand.u32 4294901760, %v7506_v51 }
 0x1de   : > { %7912 = vmatprep.subr.bf16.mxu0 %v11407_v9 }
 0x1df   : > { %v10233_v54 = vsub.f32 %v7506_v51, %v10230_v62  ;;  %v11478_v51 = vld [vmem:[#allocation45_spill] sm:$0xff] }
 0x1e1   : > { %v11270_v41 = vand.u32 4294901760, %v10233_v54 }
 0x1e3   : > { %v1365_v28 = vsub.f32 %v10233_v54, %v11270_v41  ;;  %v11496_v41 = vld [vmem:[#allocation34_spill] sm:$0xff] }
 0x1e5   : > { %7914 = vmatpush1.bf16.xpose.msra.mxu0 %v11408_v24  ;;  %v1366_v40 = vand.u32 4294901760, %v1365_v28  ;;  %v11479_v28 = vld [vmem:[#allocation46_spill] sm:$0xff] }
 0x1e6   : > { %7916 = vmatprep.subr.bf16.mxu0 %v11409_v29 }
 0x1e7   : > { %1367 = vmatprep.mubr.f32.mxu1 %v1366_v40  ;;  %v11480_v40 = vld [vmem:[#allocation47_spill] sm:$0xff] }
 0x1ed   : > { %7918 = vmatpush1.bf16.xpose.msra.mxu0 %v11410_v49 }
 0x1ee   : > { %7920 = vmatprep.subr.bf16.mxu0 %v11411_v8 }
 0x1f5   : > { %7922 = vmatpush1.bf16.xpose.msra.mxu0 %v11412_v15 }
 0x1f6   : > { %7924 = vmatprep.subr.bf16.mxu0 %v11413_v4 }
 0x1fd   : > { %7926 = vmatpush1.bf16.xpose.msra.mxu0 %v11414_v19 }
 0x1fe   : > { %7928 = vmatprep.subr.bf16.mxu0 %v11415_v14 }
 0x205   : > { %7930 = vmatpush1.bf16.xpose.msra.mxu0 %v11416_v38 }
 0x206   : > { %7932 = vmatprep.subr.bf16.mxu0 %v11417_v18 }
 0x20d   : > { %7934 = vmatpush1.bf16.xpose.msra.mxu0 %v11418_v13 }
 0x20e   : > { %7936 = vmatprep.subr.bf16.mxu0 %v11419_v55 }
 0x215   : > { %7938 = vmatpush1.bf16.xpose.msra.mxu0 %v9868_v44 }
 0x216   : > { %7940 = vmatprep.subr.bf16.mxu0 %v11474_v35 }
 0x2af   : > { %v1242_v31 = vpop.f32.mrb[0].mxu0 }
 0x2b0   : > { %v1249_v10 = vmul.f32 %v10245_v46, %v1242_v31  ;;  %v1244_v11 = vpop.f32.mrb[1].mxu0  ;;  %v11484_v31 = vld [vmem:[#allocation51_spill] sm:$0xff] }
 0x2b1   : > { %v11486_v11 = vld [vmem:[#allocation53_spill] sm:$0xff] }
 0x2b2   : > { %v1250_v57 = vadd.f32 %v1249_v10, %v1247_v39  ;;  %v11482_v39 = vld [vmem:[#allocation49_spill] sm:$0xff]  ;;  %v11485_v10 = vld [vmem:[#allocation52_spill] sm:$0xff] }
 0x2b4   : > { %v10251_v16 = vsel %vm1255_vm0, %v1250_v57, %v11476_v56  ;;  %v11481_v56 = vld [vmem:[#allocation48_spill] sm:$0xff]  ;;  %v11487_v57 = vld [vmem:[#allocation54_spill] sm:$0xff] }
 0x2b5   : > { %v1259_v20 = vadd.f32 %v11477_v17, %v10251_v16  ;;  %v11488_v17 = vld [vmem:[#allocation57_spill] sm:$0xff] }
 0x2b7   : > { %v7507_v21 = vmul.f32 -1.442695, %v1259_v20  ;;  %v11489_v20 = vld [vmem:[#allocation27_spill] sm:$0xff] }
 0x2b9   : > { %9171 = vpow2.f32 %v7507_v21  ;;  %v11490_v21 = vld [vmem:[#allocation28_spill] sm:$0xff] }
 0x2c3   : > { %v9172_v27 = vpop.eup %9171 }
 0x2c4   : > { %v1263_v30 = vadd.f32 1.0, %v9172_v27  ;;  %v11491_v27 = vld [vmem:[#allocation29_spill] sm:$0xff] }
 0x2c6   : > { %9173 = vrcp.f32 %v1263_v30  ;;  %v11492_v30 = vld [vmem:[#allocation30_spill] sm:$0xff] }
 0x2d0   : > { %v9174_v33 = vpop.eup %9173 }
 0x2d1   : > { %v10255_v34 = vand.u32 4294901760, %v9174_v33 }
 0x2d3   : > { %v1369_v58 = vsub.f32 %v9174_v33, %v10255_v34  ;;  %v11493_v33 = vld [vmem:[#allocation31_spill] sm:$0xff] }
 0x2d5   : > { %v1370_v47 = vand.u32 4294901760, %v1369_v58 }
 0x2d7   : > { %v1371_v5 = vsub.f32 %v1369_v58, %v1370_v47 }
 0x2d9   : > { %v1372_v59 = vand.u32 4294901760, %v1371_v5  ;;  %v11494_v5 = vld [vmem:[#allocation32_spill] sm:$0xff] }
 0x2db   : > { %1373 = vmatmul.mubr.f32.vlgmr.msra.gmra.mrb[0].mxu1 %v1372_v59  ;;  %v11495_v59 = vld [vmem:[#allocation33_spill] sm:$0xff] }
 0x2dc   : > { %7750 = vmatpush1.bf16.xpose.msra.mxu1 %v11478_v51  ;;  %1603 = vmatprep.mubr.f32.mxu1 %v10230_v62 }
 0x2dd   : > { %7752 = vmatprep.subr.bf16.mxu1 %v11479_v28 }
 0x2e4   : > { %7754 = vmatpush1.bf16.xpose.msra.mxu1 %v11480_v40 }
 0x2e5   : > { %7756 = vmatprep.subr.bf16.mxu1 %v11481_v56 }
 0x2ec   : > { %7758 = vmatpush1.bf16.xpose.msra.mxu1 %v11482_v39 }
 0x2ed   : > { %7760 = vmatprep.subr.bf16.mxu1 %v11483_v12 }
 0x2f4   : > { %7762 = vmatpush1.bf16.xpose.msra.mxu1 %v11484_v31 }
 0x2f5   : > { %7764 = vmatprep.subr.bf16.mxu1 %v11485_v10 }
 0x2fc   : > { %7766 = vmatpush1.bf16.xpose.msra.mxu1 %v9984_v25 }
 0x2fd   : > { %7768 = vmatprep.subr.bf16.mxu1 %v11486_v11 }
 0x304   : > { %7770 = vmatpush1.bf16.xpose.msra.mxu1 %v11487_v57 }
 0x305   : > { %7772 = vmatprep.subr.bf16.mxu1 %v10014_v22 }
 0x30c   : > { %7774 = vmatpush1.bf16.xpose.msra.mxu1 %v10026_v36  ;;  %v11501_v36 = vld [vmem:[#allocation39_spill] sm:$0xff] }
 0x30d   : > { %7776 = vmatprep.subr.bf16.mxu1 %v10034_v63  ;;  %v11499_v63 = vld [vmem:[#allocation37_spill] sm:$0xff] }
 0x314   : > { %7778 = vmatpush1.bf16.xpose.msra.mxu1 %v11488_v17  ;;  %v11497_v17 = vld [vmem:[#allocation35_spill] sm:$0xff] }
 0x315   : > { %7780 = vmatprep.subr.bf16.mxu1 %v11489_v20  ;;  %v11498_v20 = vld [vmem:[#allocation36_spill] sm:$0xff] }
 0x31b   : > { %1605 = vmatmul.mubr.f32.vlgmr.msra.gmra.mrb[0].mxu1 %v10255_v34 }
 0x31c   : > { %7782 = vmatpush1.bf16.xpose.msra.mxu1 %v11490_v21  ;;  %1740 = vmatprep.mubr.f32.mxu1 %v10233_v54  ;;  %v11500_v21 = vld [vmem:[#allocation38_spill] sm:$0xff] }
 0x31d   : > { %7784 = vmatprep.subr.bf16.mxu1 %v11491_v27  ;;  %v11502_v27 = vld [vmem:[#allocation40_spill] sm:$0xff] }
 0x324   : > { %7786 = vmatpush1.bf16.xpose.msra.mxu1 %v11492_v30  ;;  %v11503_v30 = vld [vmem:[#allocation41_spill] sm:$0xff] }
 0x325   : > { %7788 = vmatprep.subr.bf16.mxu1 %v11493_v33  ;;  %v11504_v33 = vld [vmem:[#allocation42_spill] sm:$0xff] }
 0x32c   : > { %7790 = vmatpush1.bf16.xpose.msra.mxu1 %v11494_v5 }
 0x32d   : > { %7792 = vmatprep.subr.bf16.mxu1 %v11495_v59 }
 0x334   : > { %7794 = vmatpush1.bf16.xpose.msra.mxu1 %v11496_v41 }
 0x335   : > { %7796 = vmatprep.subr.bf16.mxu1 %v11497_v17  ;;  %v11505_v17 = vand.u32 4294901760, %v10233_v54 }
 0x33c   : > { %7798 = vmatpush1.bf16.xpose.msra.mxu1 %v11498_v20 }
 0x33d   : > { %7800 = vmatprep.subr.bf16.mxu1 %v11499_v63 }
 0x344   : > { %7802 = vmatpush1.bf16.xpose.msra.mxu1 %v11500_v21 }
 0x345   : > { %7804 = vmatprep.subr.bf16.mxu1 %v11501_v36 }
 0x34c   : > { %7806 = vmatpush1.bf16.xpose.msra.mxu1 %v11502_v27 }
 0x34d   : > { %7808 = vmatprep.subr.bf16.mxu1 %v11503_v30 }
 0x354   : > { %7810 = vmatpush1.bf16.xpose.msra.mxu1 %v11504_v33 }
 0x355   : > { %7812 = vmatprep.subr.bf16.mxu1 %v11404_v7 }
 0x35b   : > { %1743 = vmatmul.mubr.f32.vlgmr.msra.gmra.mrb[0].mxu1 %v1369_v58 }
 0x35c   : > { %7814 = vmatpush1.bf16.xpose.msra.mxu1 %v11405_v26  ;;  %1847 = vmatprep.mubr.f32.mxu1 %v11505_v17 }
 0x35d   : > { %7816 = vmatprep.subr.bf16.mxu1 %v11407_v9 }
 0x364   : > { %7818 = vmatpush1.bf16.xpose.msra.mxu1 %v11408_v24 }
 0x365   : > { %7820 = vmatprep.subr.bf16.mxu1 %v11409_v29 }
 0x36c   : > { %7822 = vmatpush1.bf16.xpose.msra.mxu1 %v11410_v49 }
 0x36d   : > { %7824 = vmatprep.subr.bf16.mxu1 %v11411_v8 }
 0x374   : > { %7826 = vmatpush1.bf16.xpose.msra.mxu1 %v11412_v15 }
 0x375   : > { %7828 = vmatprep.subr.bf16.mxu1 %v11413_v4 }
 0x37c   : > { %7830 = vmatpush1.bf16.xpose.msra.mxu1 %v11414_v19 }
 0x37d   : > { %7832 = vmatprep.subr.bf16.mxu1 %v11415_v14 }
 0x384   : > { %7834 = vmatpush1.bf16.xpose.msra.mxu1 %v11416_v38 }
 0x385   : > { %7836 = vmatprep.subr.bf16.mxu1 %v11417_v18 }
 0x38c   : > { %7838 = vmatpush1.bf16.xpose.msra.mxu1 %v11418_v13 }
 0x38d   : > { %7840 = vmatprep.subr.bf16.mxu1 %v11419_v55 }
 0x394   : > { %7842 = vmatpush1.bf16.xpose.msra.mxu1 %v9868_v44 }
 0x395   : > { %7844 = vmatprep.subr.bf16.mxu1 %v10081_v3 }
 0x39b   : > { %1851 = vmatmul.mubr.f32.vlgmr.msra.gmra.mrb[0].mxu1 %v1370_v47 }
 0x39c   : > { %7846 = vmatpush1.bf16.xpose.msra.mxu1 %v10089_v53  ;;  %2017 = vmatprep.mubr.f32.mxu1 %v10230_v62 }
 0x39d   : > { %7848 = vmatprep.subr.bf16.mxu1 %v10095_v37 }
 0x3a4   : > { %7850 = vmatpush1.bf16.xpose.msra.mxu1 %v10106_v2 }
 0x3a5   : > { %7852 = vmatprep.subr.bf16.mxu1 %v10112_v52 }
 0x3ac   : > { %7854 = vmatpush1.bf16.xpose.msra.mxu1 %v10120_v45 }
 0x3ad   : > { %7856 = vmatprep.subr.bf16.mxu1 %v10126_v6 }
 0x3b4   : > { %7858 = vmatpush1.bf16.xpose.msra.mxu1 %v10134_v43 }
 0x3b5   : > { %7860 = vmatprep.subr.bf16.mxu1 %v10140_v60 }
 0x3bc   : > { %7862 = vmatpush1.bf16.xpose.msra.mxu1 %v10148_v50 }
 0x3bd   : > { %7864 = vmatprep.subr.bf16.mxu1 %v10154_v1 }
 0x3c4   : > { %7866 = vmatpush1.bf16.xpose.msra.mxu1 %v10162_v23 }
 0x3c5   : > { %7868 = vmatprep.subr.bf16.mxu1 %v10168_v32 }
 0x3cc   : > { %7870 = vmatpush1.bf16.xpose.msra.mxu1 %v10176_v61 }
 0x3cd   : > { %7872 = vmatprep.subr.bf16.mxu1 %v10182_v48 }
 0x3d4   : > { %7874 = vmatpush1.bf16.xpose.msra.mxu1 %v10190_v42  ;;  %v2134_v42 = vstv %s2133_s19 }
 0x3d5   : > { %7876 = vmatprep.subr.bf16.mxu1 %v11404_v7  ;;  %vm2135_vm1 = vcmp.eq.s32.totalorder %v2134_v42, 1 }
 0x3db   : > { %2019 = vmatmul.mubr.f32.vlgmr.msra.gmra.mrb[0].mxu1 %v10255_v34 }
 0x3dc   : > { %7878 = vmatpush1.bf16.xpose.msra.mxu1 %v11405_v26  ;;  %2121 = vmatprep.mubr.f32.mxu1 %v10230_v62  ;;  %v7508_v62 = vld [vmem:[%s9301_s15 + $0x10] sm:$0xff] }
 0x3dd   : > { %7880 = vmatprep.subr.bf16.mxu1 %v11407_v9  ;;  %v10364_v54 = vand.u32 4294901760, %v7508_v62 }
 0x3e4   : > { %7882 = vmatpush1.bf16.xpose.msra.mxu1 %v11408_v24 }
 0x3e5   : > { %7884 = vmatprep.subr.bf16.mxu1 %v11409_v29 }
 0x3ec   : > { %7886 = vmatpush1.bf16.xpose.msra.mxu1 %v11410_v49 }
 0x3ed   : > { %7888 = vmatprep.subr.bf16.mxu1 %v11411_v8 }
 0x3f4   : > { %7890 = vmatpush1.bf16.xpose.msra.mxu1 %v11412_v15 }
 0x3f5   : > { %7892 = vmatprep.subr.bf16.mxu1 %v11413_v4 }
 0x3fc   : > { %7894 = vmatpush1.bf16.xpose.msra.mxu1 %v11414_v19 }
 0x3fd   : > { %7896 = vmatprep.subr.bf16.mxu1 %v11415_v14 }
 0x404   : > { %7898 = vmatpush1.bf16.xpose.msra.mxu1 %v11416_v38 }
 0x405   : > { %7900 = vmatprep.subr.bf16.mxu1 %v11417_v18 }
 0x40c   : > { %7902 = vmatpush1.bf16.xpose.msra.mxu1 %v11418_v13 }
 0x40d   : > { %7904 = vmatprep.subr.bf16.mxu1 %v11419_v55 }
 0x414   : > { %7906 = vmatpush1.bf16.xpose.msra.mxu1 %v9868_v44 }
 0x415   : > { %8100 = vmatprep.subr.bf16.mxu1 %v11404_v7 }
 0x41b   : > { %2123 = vmatmul.mubr.f32.vlgmr.msra.gmra.mrb[0].mxu1 %v10255_v34  ;;  %v10367_v34 = vsub.f32 %v7508_v62, %v10364_v54 }
 0x41c   : > { %8102 = vmatpush1.bf16.xpose.msra.mxu1 %v11405_v26 }
 0x41d   : > { %8104 = vmatprep.subr.bf16.mxu1 %v11407_v9  ;;  %v11286_v58 = vand.u32 4294901760, %v10367_v34 }
 0x41f   : > { %v2245_v47 = vsub.f32 %v10367_v34, %v11286_v58 }
 0x421   : > { %v2246_v17 = vand.u32 4294901760, %v2245_v47  ;;  %v10384_v47 = vld [vmem:[%s11131_s6] ss:$0 sm:$0xff] }
 0x423   : > { %2247 = vmatprep.mubr.f32.mxu0 %v2246_v17 }
 0x424   : > { %8106 = vmatpush1.bf16.xpose.msra.mxu1 %v11408_v24 }
 0x425   : > { %8108 = vmatprep.subr.bf16.mxu1 %v11409_v29 }
 0x42c   : > { %8110 = vmatpush1.bf16.xpose.msra.mxu1 %v11410_v49 }
 0x42d   : > { %8112 = vmatprep.subr.bf16.mxu1 %v11411_v8 }
 0x434   : > { %8114 = vmatpush1.bf16.xpose.msra.mxu1 %v11412_v15 }
 0x435   : > { %8116 = vmatprep.subr.bf16.mxu1 %v11413_v4 }
 0x43c   : > { %8118 = vmatpush1.bf16.xpose.msra.mxu1 %v11414_v19 }
 0x43d   : > { %8120 = vmatprep.subr.bf16.mxu1 %v11415_v14 }
 0x444   : > { %8122 = vmatpush1.bf16.xpose.msra.mxu1 %v11416_v38 }
 0x445   : > { %8124 = vmatprep.subr.bf16.mxu1 %v11417_v18 }
 0x44c   : > { %8126 = vmatpush1.bf16.xpose.msra.mxu1 %v11418_v13 }
 0x44d   : > { %8128 = vmatprep.subr.bf16.mxu1 %v11419_v55 }
 0x454   : > { %8130 = vmatpush1.bf16.xpose.msra.mxu1 %v9868_v44 }
 0x455   : > { %8132 = vmatprep.subr.bf16.mxu1 %v11474_v35  ;;  %v2128_v35 = vmul.f32 %v10251_v16, %v10242_v0 }
 0x4ee   : > { %v2124_v48 = vpop.f32.mrb[0].mxu1 }
 0x4ef   : > { %v2129_v61 = vmul.f32 %v2124_v48, %v10245_v46  ;;  %v2126_v62 = vpop.f32.mrb[1].mxu1 }
 0x4f1   : > { %v2130_v32 = vadd.f32 %v2129_v61, %v2128_v35 }
 0x4f3   : > { %v10379_v23 = vsel %vm2135_vm1, %v2130_v32, %v10251_v16  ;;  %v11508_v16 = vld [vmem:[#allocation57_spill] sm:$0xff] }
 0x4f4   : > { %v2139_v17 = vadd.f32 %v10384_v47, %v10379_v23 }
 0x4f6   : > { %v7509_v58 = vmul.f32 -1.442695, %v2139_v17  ;;  %v11510_v17 = vld [vmem:[#allocation28_spill] sm:$0xff] }
 0x4f8   : > { %9175 = vpow2.f32 %v7509_v58  ;;  %v11509_v58 = vld [vmem:[#allocation27_spill] sm:$0xff] }
 0x502   : > { %v9176_v1 = vpop.eup %9175 }
 0x503   : > { %v2143_v0 = vadd.f32 1.0, %v9176_v1  ;;  %v11506_v1 = vld [vmem:[#allocation55_spill] sm:$0xff] }
 0x505   : > { %9177 = vrcp.f32 %v2143_v0  ;;  %v11507_v0 = vld [vmem:[#allocation56_spill] sm:$0xff] }
 0x50f   : > { %v9178_v48 = vpop.eup %9177 }
 0x510   : > { %v10388_v62 = vand.u32 4294901760, %v9178_v48 }
 0x512   : > { %v2249_v61 = vsub.f32 %v9178_v48, %v10388_v62  ;;  %v11511_v48 = vld [vmem:[#allocation29_spill] sm:$0xff] }
 0x514   : > { %v2250_v32 = vand.u32 4294901760, %v2249_v61 }
 0x516   : > { %v2251_v42 = vsub.f32 %v2249_v61, %v2250_v32 }
 0x518   : > { %v2252_v35 = vand.u32 4294901760, %v2251_v42  ;;  %v11512_v42 = vld [vmem:[#allocation30_spill] sm:$0xff] }
 0x51a   : > { %2253 = vmatmul.mubr.f32.vlgmr.msra.gmra.mrb[2].mxu0 %v2252_v35  ;;  %v11513_v35 = vld [vmem:[#allocation31_spill] sm:$0xff] }
 0x51b   : > { %7942 = vmatpush1.bf16.xpose.msra.mxu0 %v11478_v51  ;;  %2483 = vmatprep.mubr.f32.mxu0 %v10364_v54 }
 0x51c   : > { %7944 = vmatprep.subr.bf16.mxu0 %v11479_v28 }
 0x523   : > { %7946 = vmatpush1.bf16.xpose.msra.mxu0 %v11480_v40 }
 0x524   : > { %7948 = vmatprep.subr.bf16.mxu0 %v11481_v56 }
 0x52b   : > { %7950 = vmatpush1.bf16.xpose.msra.mxu0 %v11482_v39 }
 0x52c   : > { %7952 = vmatprep.subr.bf16.mxu0 %v11483_v12 }
 0x533   : > { %7954 = vmatpush1.bf16.xpose.msra.mxu0 %v11484_v31 }
 0x534   : > { %7956 = vmatprep.subr.bf16.mxu0 %v11485_v10 }
 0x53b   : > { %7958 = vmatpush1.bf16.xpose.msra.mxu0 %v9984_v25 }
 0x53c   : > { %7960 = vmatprep.subr.bf16.mxu0 %v11486_v11 }
 0x543   : > { %7962 = vmatpush1.bf16.xpose.msra.mxu0 %v11487_v57 }
 0x544   : > { %7964 = vmatprep.subr.bf16.mxu0 %v10014_v22 }
 0x54b   : > { %7966 = vmatpush1.bf16.xpose.msra.mxu0 %v11506_v1 }
 0x54c   : > { %7968 = vmatprep.subr.bf16.mxu0 %v11507_v0 }
 0x553   : > { %7970 = vmatpush1.bf16.xpose.msra.mxu0 %v11508_v16  ;;  %v11514_v16 = vld [vmem:[#allocation35_spill] sm:$0xff] }
 0x554   : > { %7972 = vmatprep.subr.bf16.mxu0 %v11509_v58 }
 0x55a   : > { %2485 = vmatmul.mubr.f32.vlgmr.msra.gmra.mrb[2].mxu0 %v10388_v62 }
 0x55b   : > { %7974 = vmatpush1.bf16.xpose.msra.mxu0 %v11510_v17  ;;  %2620 = vmatprep.mubr.f32.mxu0 %v10367_v34 }
 0x55c   : > { %7976 = vmatprep.subr.bf16.mxu0 %v11511_v48 }
 0x563   : > { %7978 = vmatpush1.bf16.xpose.msra.mxu0 %v11512_v42 }
 0x564   : > { %7980 = vmatprep.subr.bf16.mxu0 %v11513_v35 }
 0x56b   : > { %7982 = vmatpush1.bf16.xpose.msra.mxu0 %v11494_v5 }
 0x56c   : > { %7984 = vmatprep.subr.bf16.mxu0 %v11495_v59 }
 0x573   : > { %7986 = vmatpush1.bf16.xpose.msra.mxu0 %v11496_v41 }
 0x574   : > { %7988 = vmatprep.subr.bf16.mxu0 %v11514_v16  ;;  %v11515_v16 = vand.u32 4294901760, %v10367_v34  ;;  %v11516_v34 = vld [vmem:[#allocation17_spill] sm:$0xff] }
 0x57b   : > { %7990 = vmatpush1.bf16.xpose.msra.mxu0 %v11498_v20 }
 0x57c   : > { %7992 = vmatprep.subr.bf16.mxu0 %v11499_v63 }
 0x583   : > { %7994 = vmatpush1.bf16.xpose.msra.mxu0 %v11500_v21 }
 0x584   : > { %7996 = vmatprep.subr.bf16.mxu0 %v11501_v36 }
 0x58b   : > { %7998 = vmatpush1.bf16.xpose.msra.mxu0 %v11502_v27 }
 0x58c   : > { %8000 = vmatprep.subr.bf16.mxu0 %v11503_v30 }
 0x593   : > { %8002 = vmatpush1.bf16.xpose.msra.mxu0 %v11504_v33 }
 0x594   : > { %8004 = vmatprep.subr.bf16.mxu0 %v11404_v7 }
 0x59a   : > { %2623 = vmatmul.mubr.f32.vlgmr.msra.gmra.mrb[2].mxu0 %v2249_v61  ;;  %v11517_v61 = vld [vmem:[#allocation23_spill] sm:$0xff] }
 0x59b   : > { %8006 = vmatpush1.bf16.xpose.msra.mxu0 %v11405_v26  ;;  %2727 = vmatprep.mubr.f32.mxu0 %v11515_v16  ;;  %v11519_v16 = vld [vmem:[#allocation25_spill] sm:$0xff] }
 0x59c   : > { %8008 = vmatprep.subr.bf16.mxu0 %v11407_v9 }
 0x5a3   : > { %8010 = vmatpush1.bf16.xpose.msra.mxu0 %v11408_v24 }
 0x5a4   : > { %8012 = vmatprep.subr.bf16.mxu0 %v11409_v29 }
 0x5ab   : > { %8014 = vmatpush1.bf16.xpose.msra.mxu0 %v11410_v49 }
 0x5ac   : > { %8016 = vmatprep.subr.bf16.mxu0 %v11411_v8 }
 0x5b3   : > { %8018 = vmatpush1.bf16.xpose.msra.mxu0 %v11412_v15 }
 0x5b4   : > { %8020 = vmatprep.subr.bf16.mxu0 %v11413_v4 }
 0x5bb   : > { %8022 = vmatpush1.bf16.xpose.msra.mxu0 %v11414_v19 }
 0x5bc   : > { %8024 = vmatprep.subr.bf16.mxu0 %v11415_v14 }
 0x5c3   : > { %8026 = vmatpush1.bf16.xpose.msra.mxu0 %v11416_v38 }
 0x5c4   : > { %8028 = vmatprep.subr.bf16.mxu0 %v11417_v18 }
 0x5cb   : > { %8030 = vmatpush1.bf16.xpose.msra.mxu0 %v11418_v13 }
 0x5cc   : > { %8032 = vmatprep.subr.bf16.mxu0 %v11419_v55 }
 0x5d3   : > { %8034 = vmatpush1.bf16.xpose.msra.mxu0 %v9868_v44 }
 0x5d4   : > { %8036 = vmatprep.subr.bf16.mxu0 %v10081_v3 }
 0x5da   : > { %2731 = vmatmul.mubr.f32.vlgmr.msra.gmra.mrb[2].mxu0 %v2250_v32  ;;  %v11518_v32 = vld [vmem:[#allocation24_spill] sm:$0xff] }
 0x5db   : > { %8038 = vmatpush1.bf16.xpose.msra.mxu0 %v10089_v53  ;;  %2897 = vmatprep.mubr.f32.mxu0 %v10364_v54 }
 0x5dc   : > { %8040 = vmatprep.subr.bf16.mxu0 %v10095_v37 }
 0x5e3   : > { %8042 = vmatpush1.bf16.xpose.msra.mxu0 %v10106_v2  ;;  %v11520_v2 = vld [vmem:[#allocation18_spill] sm:$0xff] }
 0x5e4   : > { %8044 = vmatprep.subr.bf16.mxu0 %v10112_v52  ;;  %v11521_v52 = vld [vmem:[#allocation19_spill] sm:$0xff] }
 0x5eb   : > { %8046 = vmatpush1.bf16.xpose.msra.mxu0 %v10120_v45 }
 0x5ec   : > { %8048 = vmatprep.subr.bf16.mxu0 %v10126_v6 }
 0x5f3   : > { %8050 = vmatpush1.bf16.xpose.msra.mxu0 %v10134_v43 }
 0x5f4   : > { %8052 = vmatprep.subr.bf16.mxu0 %v10140_v60 }
 0x5fb   : > { %8054 = vmatpush1.bf16.xpose.msra.mxu0 %v10148_v50 }
 0x5fc   : > { %8056 = vmatprep.subr.bf16.mxu0 %v11516_v34  ;;  %v3014_v34 = vstv %s3013_s24 }
 0x5fd   : > { %vm3015_vm2 = vcmp.eq.s32.totalorder %v3014_v34, 1 }
 0x603   : > { %8058 = vmatpush1.bf16.xpose.msra.mxu0 %v11517_v61 }
 0x604   : > { %8060 = vmatprep.subr.bf16.mxu0 %v11518_v32 }
 0x60b   : > { %8062 = vmatpush1.bf16.xpose.msra.mxu0 %v11519_v16 }
 0x60c   : > { %8064 = vmatprep.subr.bf16.mxu0 %v11520_v2 }
 0x613   : > { %8066 = vmatpush1.bf16.xpose.msra.mxu0 %v11521_v52 }
 0x614   : > { %8068 = vmatprep.subr.bf16.mxu0 %v11404_v7 }
 0x61a   : > { %2899 = vmatmul.mubr.f32.vlgmr.msra.gmra.mrb[2].mxu0 %v10388_v62 }
 0x61b   : > { %8070 = vmatpush1.bf16.xpose.msra.mxu0 %v11405_v26  ;;  %3001 = vmatprep.mubr.f32.mxu0 %v10364_v54  ;;  %v11522_v54 = vld [vmem:[#allocation44_spill] sm:$0xff] }
 0x61c   : > { %8072 = vmatprep.subr.bf16.mxu0 %v11407_v9 }
 0x623   : > { %8074 = vmatpush1.bf16.xpose.msra.mxu0 %v11408_v24 }
 0x624   : > { %8076 = vmatprep.subr.bf16.mxu0 %v11409_v29 }
 0x62b   : > { %8078 = vmatpush1.bf16.xpose.msra.mxu0 %v11410_v49 }
 0x62c   : > { %8080 = vmatprep.subr.bf16.mxu0 %v11411_v8 }
 0x633   : > { %8082 = vmatpush1.bf16.xpose.msra.mxu0 %v11412_v15 }
 0x634   : > { %8084 = vmatprep.subr.bf16.mxu0 %v11413_v4 }
 0x63b   : > { %8086 = vmatpush1.bf16.xpose.msra.mxu0 %v11414_v19 }
 0x63c   : > { %8088 = vmatprep.subr.bf16.mxu0 %v11415_v14 }
 0x643   : > { %8090 = vmatpush1.bf16.xpose.msra.mxu0 %v11416_v38 }
 0x644   : > { %8092 = vmatprep.subr.bf16.mxu0 %v11417_v18 }
 0x64b   : > { %8094 = vmatpush1.bf16.xpose.msra.mxu0 %v11418_v13 }
 0x64c   : > { %8096 = vmatprep.subr.bf16.mxu0 %v11419_v55 }
 0x653   : > { %8098 = vmatpush1.bf16.xpose.msra.mxu0 %v9868_v44 }
 0x654   : > { %8292 = vmatprep.subr.bf16.mxu0 %v11404_v7 }
 0x65a   : > { %3003 = vmatmul.mubr.f32.vlgmr.msra.gmra.mrb[2].mxu0 %v10388_v62  ;;  %v7510_v62 = vld [vmem:[%s9301_s15 + $0x18] sm:$0xff] }
 0x65b   : > { %8294 = vmatpush1.bf16.xpose.msra.mxu0 %v11405_v26  ;;  %v10497_v52 = vand.u32 4294901760, %v7510_v62 }
 0x65c   : > { %8296 = vmatprep.subr.bf16.mxu0 %v11407_v9 }
 0x65d   : > { %v10500_v2 = vsub.f32 %v7510_v62, %v10497_v52 }
 0x65f   : > { %v11305_v16 = vand.u32 4294901760, %v10500_v2 }
 0x661   : > { %v3125_v32 = vsub.f32 %v10500_v2, %v11305_v16 }
 0x663   : > { %8298 = vmatpush1.bf16.xpose.msra.mxu0 %v11408_v24  ;;  %v3126_v61 = vand.u32 4294901760, %v3125_v32 }
 0x664   : > { %8300 = vmatprep.subr.bf16.mxu0 %v11409_v29 }
 0x665   : > { %3127 = vmatprep.mubr.f32.mxu1 %v3126_v61 }
 0x66b   : > { %8302 = vmatpush1.bf16.xpose.msra.mxu0 %v11410_v49 }
 0x66c   : > { %8304 = vmatprep.subr.bf16.mxu0 %v11411_v8 }
 0x673   : > { %8306 = vmatpush1.bf16.xpose.msra.mxu0 %v11412_v15 }
 0x674   : > { %8308 = vmatprep.subr.bf16.mxu0 %v11413_v4 }
 0x67b   : > { %8310 = vmatpush1.bf16.xpose.msra.mxu0 %v11414_v19 }
 0x67c   : > { %8312 = vmatprep.subr.bf16.mxu0 %v11415_v14 }
 0x683   : > { %8314 = vmatpush1.bf16.xpose.msra.mxu0 %v11416_v38 }
 0x684   : > { %8316 = vmatprep.subr.bf16.mxu0 %v11417_v18 }
 0x68b   : > { %8318 = vmatpush1.bf16.xpose.msra.mxu0 %v11418_v13 }
 0x68c   : > { %8320 = vmatprep.subr.bf16.mxu0 %v11419_v55 }
 0x693   : > { %8322 = vmatpush1.bf16.xpose.msra.mxu0 %v9868_v44 }
 0x694   : > { %8324 = vmatprep.subr.bf16.mxu0 %v11522_v54  ;;  %v11523_v54 = vld [vmem:[#allocation20_spill] sm:$0xff] }
 0x695   : > { %v3008_v60 = vmul.f32 %v10379_v23, %v11523_v54 }
 0x72d   : > { %v3004_v50 = vpop.f32.mrb[2].mxu0 }
 0x72e   : > { %v3009_v43 = vmul.f32 %v3004_v50, %v10245_v46  ;;  %v3006_v62 = vpop.f32.mrb[3].mxu0 }
 0x730   : > { %v3010_v6 = vadd.f32 %v3009_v43, %v3008_v60  ;;  %v11528_v43 = vld [vmem:[#allocation6_spill] sm:$0xff]  ;;  %v11529_v60 = vld [vmem:[#allocation7_spill] sm:$0xff] }
 0x732   : > { %v10512_v45 = vsel %vm3015_vm2, %v3010_v6, %v10379_v23  ;;  %v11526_v6 = vand.u32 4294901760, %v10500_v2  ;;  %v11530_v23 = vld [vmem:[#allocation8_spill] sm:$0xff] }
 0x733   : > { %v3019_v32 = vadd.f32 %v10384_v47, %v10512_v45 }
 0x735   : > { %v7511_v61 = vmul.f32 -1.442695, %v3019_v32  ;;  %v11533_v32 = vld [vmem:[#allocation13_spill] sm:$0xff] }
 0x737   : > { %9179 = vpow2.f32 %v7511_v61  ;;  %v11534_v61 = vld [vmem:[#allocation14_spill] sm:$0xff] }
 0x741   : > { %v9180_v16 = vpop.eup %9179 }
 0x742   : > { %v3023_v37 = vadd.f32 1.0, %v9180_v16  ;;  %v11531_v16 = vld [vmem:[#allocation9_spill] sm:$0xff] }
 0x744   : > { %9181 = vrcp.f32 %v3023_v37  ;;  %v11525_v37 = vld [vmem:[#allocation35_spill] sm:$0xff] }
 0x74e   : > { %v9182_v53 = vpop.eup %9181 }
 0x74f   : > { %v10516_v3 = vand.u32 4294901760, %v9182_v53 }
 0x751   : > { %v3129_v54 = vsub.f32 %v9182_v53, %v10516_v3  ;;  %v11524_v53 = vld [vmem:[#allocation57_spill] sm:$0xff] }
 0x753   : > { %v3130_v50 = vand.u32 4294901760, %v3129_v54 }
 0x755   : > { %v3131_v62 = vsub.f32 %v3129_v54, %v3130_v50 }
 0x757   : > { %v3132_v34 = vand.u32 4294901760, %v3131_v62  ;;  %v11535_v62 = vld [vmem:[#allocation15_spill] sm:$0xff] }
 0x759   : > { %3133 = vmatmul.mubr.f32.vlgmr.msra.gmra.mrb[2].mxu1 %v3132_v34  ;;  %v11536_v34 = vld [vmem:[#allocation16_spill] sm:$0xff] }
 0x75a   : > { %8134 = vmatpush1.bf16.xpose.msra.mxu1 %v11478_v51  ;;  %3363 = vmatprep.mubr.f32.mxu1 %v10497_v52 }
 0x75b   : > { %8136 = vmatprep.subr.bf16.mxu1 %v11479_v28 }
 0x762   : > { %8138 = vmatpush1.bf16.xpose.msra.mxu1 %v11480_v40 }
 0x763   : > { %8140 = vmatprep.subr.bf16.mxu1 %v11481_v56 }
 0x76a   : > { %8142 = vmatpush1.bf16.xpose.msra.mxu1 %v11482_v39 }
 0x76b   : > { %8144 = vmatprep.subr.bf16.mxu1 %v11483_v12 }
 0x772   : > { %8146 = vmatpush1.bf16.xpose.msra.mxu1 %v11484_v31 }
 0x773   : > { %8148 = vmatprep.subr.bf16.mxu1 %v11485_v10 }
 0x77a   : > { %8150 = vmatpush1.bf16.xpose.msra.mxu1 %v9984_v25 }
 0x77b   : > { %8152 = vmatprep.subr.bf16.mxu1 %v11486_v11 }
 0x782   : > { %8154 = vmatpush1.bf16.xpose.msra.mxu1 %v11487_v57 }
 0x783   : > { %8156 = vmatprep.subr.bf16.mxu1 %v10014_v22 }
 0x78a   : > { %8158 = vmatpush1.bf16.xpose.msra.mxu1 %v11506_v1 }
 0x78b   : > { %8160 = vmatprep.subr.bf16.mxu1 %v11507_v0 }
 0x792   : > { %8162 = vmatpush1.bf16.xpose.msra.mxu1 %v11524_v53 }
 0x793   : > { %8164 = vmatprep.subr.bf16.mxu1 %v11509_v58 }
 0x799   : > { %3365 = vmatmul.mubr.f32.vlgmr.msra.gmra.mrb[2].mxu1 %v10516_v3 }
 0x79a   : > { %8166 = vmatpush1.bf16.xpose.msra.mxu1 %v11510_v17  ;;  %3500 = vmatprep.mubr.f32.mxu1 %v10500_v2  ;;  %v11527_v2 = vld [vmem:[#allocation5_spill] sm:$0xff] }
 0x79b   : > { %8168 = vmatprep.subr.bf16.mxu1 %v11511_v48 }
 0x7a2   : > { %8170 = vmatpush1.bf16.xpose.msra.mxu1 %v11512_v42 }
 0x7a3   : > { %8172 = vmatprep.subr.bf16.mxu1 %v11513_v35 }
 0x7aa   : > { %8174 = vmatpush1.bf16.xpose.msra.mxu1 %v11494_v5 }
 0x7ab   : > { %8176 = vmatprep.subr.bf16.mxu1 %v11495_v59 }
 0x7b2   : > { %8178 = vmatpush1.bf16.xpose.msra.mxu1 %v11496_v41 }
 0x7b3   : > { %8180 = vmatprep.subr.bf16.mxu1 %v11525_v37 }
 0x7ba   : > { %8182 = vmatpush1.bf16.xpose.msra.mxu1 %v11498_v20 }
 0x7bb   : > { %8184 = vmatprep.subr.bf16.mxu1 %v11499_v63 }
 0x7c2   : > { %8186 = vmatpush1.bf16.xpose.msra.mxu1 %v11500_v21 }
 0x7c3   : > { %8188 = vmatprep.subr.bf16.mxu1 %v11501_v36 }
 0x7ca   : > { %8190 = vmatpush1.bf16.xpose.msra.mxu1 %v11502_v27 }
 0x7cb   : > { %8192 = vmatprep.subr.bf16.mxu1 %v11503_v30 }
 0x7d2   : > { %8194 = vmatpush1.bf16.xpose.msra.mxu1 %v11504_v33 }
 0x7d3   : > { %8196 = vmatprep.subr.bf16.mxu1 %v11404_v7 }
 0x7d9   : > { %3503 = vmatmul.mubr.f32.vlgmr.msra.gmra.mrb[2].mxu1 %v3129_v54  ;;  %v11532_v54 = vld [vmem:[#allocation12_spill] sm:$0xff] }
 0x7da   : > { %8198 = vmatpush1.bf16.xpose.msra.mxu1 %v11405_v26  ;;  %3607 = vmatprep.mubr.f32.mxu1 %v11526_v6  ;;  %v11538_v6 = vld [vmem:[#allocation23_spill] sm:$0xff] }
 0x7db   : > { %8200 = vmatprep.subr.bf16.mxu1 %v11407_v9 }
 0x7e2   : > { %8202 = vmatpush1.bf16.xpose.msra.mxu1 %v11408_v24 }
 0x7e3   : > { %8204 = vmatprep.subr.bf16.mxu1 %v11409_v29 }
 0x7ea   : > { %8206 = vmatpush1.bf16.xpose.msra.mxu1 %v11410_v49 }
 0x7eb   : > { %8208 = vmatprep.subr.bf16.mxu1 %v11411_v8 }
 0x7f2   : > { %8210 = vmatpush1.bf16.xpose.msra.mxu1 %v11412_v15 }
 0x7f3   : > { %8212 = vmatprep.subr.bf16.mxu1 %v11413_v4 }
 0x7fa   : > { %8214 = vmatpush1.bf16.xpose.msra.mxu1 %v11414_v19 }
 0x7fb   : > { %8216 = vmatprep.subr.bf16.mxu1 %v11415_v14 }
 0x802   : > { %8218 = vmatpush1.bf16.xpose.msra.mxu1 %v11416_v38 }
 0x803   : > { %8220 = vmatprep.subr.bf16.mxu1 %v11417_v18 }
 0x80a   : > { %8222 = vmatpush1.bf16.xpose.msra.mxu1 %v11418_v13 }
 0x80b   : > { %8224 = vmatprep.subr.bf16.mxu1 %v11419_v55 }
 0x812   : > { %8226 = vmatpush1.bf16.xpose.msra.mxu1 %v9868_v44 }
 0x813   : > { %8228 = vmatprep.subr.bf16.mxu1 %v11527_v2 }
 0x819   : > { %3611 = vmatmul.mubr.f32.vlgmr.msra.gmra.mrb[2].mxu1 %v3130_v50  ;;  %v11537_v50 = vld [vmem:[#allocation17_spill] sm:$0xff] }
 0x81a   : > { %8230 = vmatpush1.bf16.xpose.msra.mxu1 %v11528_v43  ;;  %3777 = vmatprep.mubr.f32.mxu1 %v10497_v52  ;;  %v11539_v43 = vld [vmem:[#allocation24_spill] sm:$0xff] }
 0x81b   : > { %8232 = vmatprep.subr.bf16.mxu1 %v11529_v60  ;;  %v11540_v60 = vld [vmem:[#allocation25_spill] sm:$0xff] }
 0x822   : > { %8234 = vmatpush1.bf16.xpose.msra.mxu1 %v11530_v23  ;;  %v11541_v23 = vld [vmem:[#allocation18_spill] sm:$0xff] }
 0x823   : > { %8236 = vmatprep.subr.bf16.mxu1 %v11531_v16  ;;  %v11542_v16 = vld [vmem:[#allocation19_spill] sm:$0xff] }
 0x82a   : > { %8238 = vmatpush1.bf16.xpose.msra.mxu1 %v11532_v54 }
 0x82b   : > { %8240 = vmatprep.subr.bf16.mxu1 %v11533_v32 }
 0x832   : > { %8242 = vmatpush1.bf16.xpose.msra.mxu1 %v11534_v61 }
 0x833   : > { %8244 = vmatprep.subr.bf16.mxu1 %v11535_v62 }
 0x83a   : > { %8246 = vmatpush1.bf16.xpose.msra.mxu1 %v11536_v34 }
 0x83b   : > { %8248 = vmatprep.subr.bf16.mxu1 %v11537_v50  ;;  %v3894_v50 = vstv %s3893_s26 }
 0x83c   : > { %vm3895_vm3 = vcmp.eq.s32.totalorder %v3894_v50, 1 }
 0x842   : > { %8250 = vmatpush1.bf16.xpose.msra.mxu1 %v11538_v6 }
 0x843   : > { %8252 = vmatprep.subr.bf16.mxu1 %v11539_v43 }
 0x84a   : > { %8254 = vmatpush1.bf16.xpose.msra.mxu1 %v11540_v60 }
 0x84b   : > { %8256 = vmatprep.subr.bf16.mxu1 %v11541_v23 }
 0x852   : > { %8258 = vmatpush1.bf16.xpose.msra.mxu1 %v11542_v16 }
 0x853   : > { %8260 = vmatprep.subr.bf16.mxu1 %v11404_v7 }
 0x859   : > { %3779 = vmatmul.mubr.f32.vlgmr.msra.gmra.mrb[2].mxu1 %v10516_v3 }
 0x85a   : > { %8262 = vmatpush1.bf16.xpose.msra.mxu1 %v11405_v26  ;;  %3881 = vmatprep.mubr.f32.mxu1 %v10497_v52  ;;  %v7512_v52 = vld [vmem:[%s9301_s15 + $0x20] sm:$0xff] }
 0x85b   : > { %8264 = vmatprep.subr.bf16.mxu1 %v11407_v9  ;;  %v10625_v16 = vand.u32 4294901760, %v7512_v52 }
 0x85d   : > { %v10628_v23 = vsub.f32 %v7512_v52, %v10625_v16 }
 0x85f   : > { %v11312_v60 = vand.u32 4294901760, %v10628_v23 }
 0x861   : > { %v4005_v43 = vsub.f32 %v10628_v23, %v11312_v60 }
 0x862   : > { %8266 = vmatpush1.bf16.xpose.msra.mxu1 %v11408_v24 }
 0x863   : > { %8268 = vmatprep.subr.bf16.mxu1 %v11409_v29  ;;  %v4006_v6 = vand.u32 4294901760, %v4005_v43 }
 0x865   : > { %4007 = vmatprep.mubr.f32.mxu0 %v4006_v6 }
 0x86a   : > { %8270 = vmatpush1.bf16.xpose.msra.mxu1 %v11410_v49 }
 0x86b   : > { %8272 = vmatprep.subr.bf16.mxu1 %v11411_v8 }
 0x872   : > { %8274 = vmatpush1.bf16.xpose.msra.mxu1 %v11412_v15 }
 0x873   : > { %8276 = vmatprep.subr.bf16.mxu1 %v11413_v4 }
 0x87a   : > { %8278 = vmatpush1.bf16.xpose.msra.mxu1 %v11414_v19 }
 0x87b   : > { %8280 = vmatprep.subr.bf16.mxu1 %v11415_v14 }
 0x882   : > { %8282 = vmatpush1.bf16.xpose.msra.mxu1 %v11416_v38 }
 0x883   : > { %8284 = vmatprep.subr.bf16.mxu1 %v11417_v18 }
 0x88a   : > { %8286 = vmatpush1.bf16.xpose.msra.mxu1 %v11418_v13 }
 0x88b   : > { %8288 = vmatprep.subr.bf16.mxu1 %v11419_v55 }
 0x892   : > { %8290 = vmatpush1.bf16.xpose.msra.mxu1 %v9868_v44 }
 0x893   : > { %8484 = vmatprep.subr.bf16.mxu1 %v11404_v7 }
 0x899   : > { %3883 = vmatmul.mubr.f32.vlgmr.msra.gmra.mrb[2].mxu1 %v10516_v3  ;;  %v11543_v3 = vld [vmem:[#allocation44_spill] sm:$0xff] }
 0x89a   : > { %8486 = vmatpush1.bf16.xpose.msra.mxu1 %v11405_v26 }
 0x89b   : > { %8488 = vmatprep.subr.bf16.mxu1 %v11407_v9 }
 0x8a2   : > { %8490 = vmatpush1.bf16.xpose.msra.mxu1 %v11408_v24 }
 0x8a3   : > { %8492 = vmatprep.subr.bf16.mxu1 %v11409_v29 }
 0x8aa   : > { %8494 = vmatpush1.bf16.xpose.msra.mxu1 %v11410_v49 }
 0x8ab   : > { %8496 = vmatprep.subr.bf16.mxu1 %v11411_v8 }
 0x8b2   : > { %8498 = vmatpush1.bf16.xpose.msra.mxu1 %v11412_v15 }
 0x8b3   : > { %8500 = vmatprep.subr.bf16.mxu1 %v11413_v4 }
 0x8ba   : > { %8502 = vmatpush1.bf16.xpose.msra.mxu1 %v11414_v19 }
 0x8bb   : > { %8504 = vmatprep.subr.bf16.mxu1 %v11415_v14 }
 0x8c2   : > { %8506 = vmatpush1.bf16.xpose.msra.mxu1 %v11416_v38 }
 0x8c3   : > { %8508 = vmatprep.subr.bf16.mxu1 %v11417_v18 }
 0x8ca   : > { %8510 = vmatpush1.bf16.xpose.msra.mxu1 %v11418_v13 }
 0x8cb   : > { %8512 = vmatprep.subr.bf16.mxu1 %v11419_v55 }
 0x8d2   : > { %8514 = vmatpush1.bf16.xpose.msra.mxu1 %v9868_v44 }
 0x8d3   : > { %8516 = vmatprep.subr.bf16.mxu1 %v11543_v3  ;;  %v11544_v3 = vld [vmem:[#allocation20_spill] sm:$0xff] }
 0x8d4   : > { %v3888_v62 = vmul.f32 %v10512_v45, %v11544_v3 }
 0x96c   : > { %v3884_v34 = vpop.f32.mrb[2].mxu1 }
 0x96d   : > { %v3889_v61 = vmul.f32 %v3884_v34, %v10245_v46  ;;  %v3886_v52 = vpop.f32.mrb[3].mxu1 }
 0x96f   : > { %v3890_v32 = vadd.f32 %v3889_v61, %v3888_v62  ;;  %v11551_v61 = vld [vmem:[#allocation8_spill] sm:$0xff]  ;;  %v11552_v62 = vld [vmem:[#allocation9_spill] sm:$0xff] }
 0x971   : > { %v10640_v54 = vsel %vm3895_vm3, %v3890_v32, %v10512_v45  ;;  %v11546_v45 = vld [vmem:[#allocation26_spill] sm:$0xff]  ;;  %v11550_v32 = vld [vmem:[#allocation7_spill] sm:$0xff] }
 0x972   : > { %v3899_v43 = vadd.f32 %v10384_v47, %v10640_v54 }
 0x974   : > { %v7513_v6 = vmul.f32 -1.442695, %v3899_v43  ;;  %v11554_v43 = vld [vmem:[#allocation13_spill] sm:$0xff] }
 0x976   : > { %9183 = vpow2.f32 %v7513_v6  ;;  %v11555_v6 = vld [vmem:[#allocation14_spill] sm:$0xff] }
 0x980   : > { %v9184_v60 = vpop.eup %9183 }
 0x981   : > { %v3903_v2 = vadd.f32 1.0, %v9184_v60  ;;  %v11548_v60 = vld [vmem:[#allocation5_spill] sm:$0xff] }
 0x983   : > { %9185 = vrcp.f32 %v3903_v2  ;;  %v11547_v2 = vld [vmem:[#allocation43_spill] sm:$0xff] }
 0x98d   : > { %v9186_v44 = vpop.eup %9185 }
 0x98e   : > { %v10644_v55 = vand.u32 4294901760, %v9186_v44 }
 0x990   : > { %v4009_v3 = vsub.f32 %v9186_v44, %v10644_v55  ;;  %v11545_v44 = vand.u32 4294901760, %v10628_v23 }
 0x992   : > { %v4010_v34 = vand.u32 4294901760, %v4009_v3 }
 0x994   : > { %v4011_v52 = vsub.f32 %v4009_v3, %v4010_v34 }
 0x996   : > { %v4012_v50 = vand.u32 4294901760, %v4011_v52  ;;  %v11556_v52 = vld [vmem:[#allocation15_spill] sm:$0xff] }
 0x998   : > { %4013 = vmatmul.mubr.f32.vlgmr.msra.gmra.mrb[4].mxu0 %v4012_v50  ;;  %v11557_v50 = vld [vmem:[#allocation16_spill] sm:$0xff] }
 0x999   : > { %8326 = vmatpush1.bf16.xpose.msra.mxu0 %v11478_v51  ;;  %4243 = vmatprep.mubr.f32.mxu0 %v10625_v16 }
 0x99a   : > { %8328 = vmatprep.subr.bf16.mxu0 %v11479_v28 }
 0x9a1   : > { %8330 = vmatpush1.bf16.xpose.msra.mxu0 %v11480_v40 }
 0x9a2   : > { %8332 = vmatprep.subr.bf16.mxu0 %v11481_v56 }
 0x9a9   : > { %8334 = vmatpush1.bf16.xpose.msra.mxu0 %v11482_v39 }
 0x9aa   : > { %8336 = vmatprep.subr.bf16.mxu0 %v11483_v12 }
 0x9b1   : > { %8338 = vmatpush1.bf16.xpose.msra.mxu0 %v11484_v31 }
 0x9b2   : > { %8340 = vmatprep.subr.bf16.mxu0 %v11485_v10 }
 0x9b9   : > { %8342 = vmatpush1.bf16.xpose.msra.mxu0 %v9984_v25 }
 0x9ba   : > { %8344 = vmatprep.subr.bf16.mxu0 %v11486_v11 }
 0x9c1   : > { %8346 = vmatpush1.bf16.xpose.msra.mxu0 %v11487_v57 }
 0x9c2   : > { %8348 = vmatprep.subr.bf16.mxu0 %v10014_v22 }
 0x9c9   : > { %8350 = vmatpush1.bf16.xpose.msra.mxu0 %v11506_v1 }
 0x9ca   : > { %8352 = vmatprep.subr.bf16.mxu0 %v11507_v0 }
 0x9d1   : > { %8354 = vmatpush1.bf16.xpose.msra.mxu0 %v11524_v53 }
 0x9d2   : > { %8356 = vmatprep.subr.bf16.mxu0 %v11509_v58 }
 0x9d8   : > { %4245 = vmatmul.mubr.f32.vlgmr.msra.gmra.mrb[4].mxu0 %v10644_v55 }
 0x9d9   : > { %8358 = vmatpush1.bf16.xpose.msra.mxu0 %v11510_v17  ;;  %4380 = vmatprep.mubr.f32.mxu0 %v10628_v23  ;;  %v11549_v23 = vld [vmem:[#allocation6_spill] sm:$0xff] }
 0x9da   : > { %8360 = vmatprep.subr.bf16.mxu0 %v11511_v48 }
 0x9e1   : > { %8362 = vmatpush1.bf16.xpose.msra.mxu0 %v11512_v42 }
 0x9e2   : > { %8364 = vmatprep.subr.bf16.mxu0 %v11513_v35 }
 0x9e9   : > { %8366 = vmatpush1.bf16.xpose.msra.mxu0 %v11494_v5 }
 0x9ea   : > { %8368 = vmatprep.subr.bf16.mxu0 %v11495_v59 }
 0x9f1   : > { %8370 = vmatpush1.bf16.xpose.msra.mxu0 %v11496_v41 }
 0x9f2   : > { %8372 = vmatprep.subr.bf16.mxu0 %v11525_v37 }
 0x9f9   : > { %8374 = vmatpush1.bf16.xpose.msra.mxu0 %v11498_v20 }
 0x9fa   : > { %8376 = vmatprep.subr.bf16.mxu0 %v11499_v63 }
 0xa01   : > { %8378 = vmatpush1.bf16.xpose.msra.mxu0 %v11500_v21 }
 0xa02   : > { %8380 = vmatprep.subr.bf16.mxu0 %v11501_v36 }
 0xa09   : > { %8382 = vmatpush1.bf16.xpose.msra.mxu0 %v11502_v27 }
 0xa0a   : > { %8384 = vmatprep.subr.bf16.mxu0 %v11503_v30 }
 0xa11   : > { %8386 = vmatpush1.bf16.xpose.msra.mxu0 %v11504_v33 }
 0xa12   : > { %8388 = vmatprep.subr.bf16.mxu0 %v11404_v7 }
 0xa18   : > { %4383 = vmatmul.mubr.f32.vlgmr.msra.gmra.mrb[4].mxu0 %v4009_v3  ;;  %v11553_v3 = vld [vmem:[#allocation12_spill] sm:$0xff] }
 0xa19   : > { %8390 = vmatpush1.bf16.xpose.msra.mxu0 %v11405_v26  ;;  %4487 = vmatprep.mubr.f32.mxu0 %v11545_v44  ;;  %v11559_v44 = vld [vmem:[#allocation23_spill] sm:$0xff] }
 0xa1a   : > { %8392 = vmatprep.subr.bf16.mxu0 %v11407_v9 }
 0xa21   : > { %8394 = vmatpush1.bf16.xpose.msra.mxu0 %v11408_v24 }
 0xa22   : > { %8396 = vmatprep.subr.bf16.mxu0 %v11409_v29 }
 0xa29   : > { %8398 = vmatpush1.bf16.xpose.msra.mxu0 %v11410_v49 }
 0xa2a   : > { %8400 = vmatprep.subr.bf16.mxu0 %v11411_v8 }
 0xa31   : > { %8402 = vmatpush1.bf16.xpose.msra.mxu0 %v11412_v15 }
 0xa32   : > { %8404 = vmatprep.subr.bf16.mxu0 %v11413_v4 }
 0xa39   : > { %8406 = vmatpush1.bf16.xpose.msra.mxu0 %v11414_v19 }
 0xa3a   : > { %8408 = vmatprep.subr.bf16.mxu0 %v11415_v14 }
 0xa41   : > { %8410 = vmatpush1.bf16.xpose.msra.mxu0 %v11416_v38 }
 0xa42   : > { %8412 = vmatprep.subr.bf16.mxu0 %v11417_v18 }
 0xa49   : > { %8414 = vmatpush1.bf16.xpose.msra.mxu0 %v11418_v13 }
 0xa4a   : > { %8416 = vmatprep.subr.bf16.mxu0 %v11546_v45 }
 0xa51   : > { %8418 = vmatpush1.bf16.xpose.msra.mxu0 %v11547_v2 }
 0xa52   : > { %8420 = vmatprep.subr.bf16.mxu0 %v11548_v60 }
 0xa58   : > { %4491 = vmatmul.mubr.f32.vlgmr.msra.gmra.mrb[4].mxu0 %v4010_v34  ;;  %v11558_v34 = vld [vmem:[#allocation17_spill] sm:$0xff] }
 0xa59   : > { %8422 = vmatpush1.bf16.xpose.msra.mxu0 %v11549_v23  ;;  %4657 = vmatprep.mubr.f32.mxu0 %v10625_v16  ;;  %v11560_v23 = vld [vmem:[#allocation24_spill] sm:$0xff] }
 0xa5a   : > { %8424 = vmatprep.subr.bf16.mxu0 %v11550_v32  ;;  %v11561_v32 = vld [vmem:[#allocation25_spill] sm:$0xff] }
 0xa61   : > { %8426 = vmatpush1.bf16.xpose.msra.mxu0 %v11551_v61  ;;  %v11562_v61 = vld [vmem:[#allocation18_spill] sm:$0xff] }
 0xa62   : > { %8428 = vmatprep.subr.bf16.mxu0 %v11552_v62  ;;  %v11563_v62 = vld [vmem:[#allocation19_spill] sm:$0xff] }
 0xa69   : > { %8430 = vmatpush1.bf16.xpose.msra.mxu0 %v11553_v3 }
 0xa6a   : > { %8432 = vmatprep.subr.bf16.mxu0 %v11554_v43 }
 0xa71   : > { %8434 = vmatpush1.bf16.xpose.msra.mxu0 %v11555_v6 }
 0xa72   : > { %8436 = vmatprep.subr.bf16.mxu0 %v11556_v52 }
 0xa79   : > { %8438 = vmatpush1.bf16.xpose.msra.mxu0 %v11557_v50 }
 0xa7a   : > { %8440 = vmatprep.subr.bf16.mxu0 %v11558_v34  ;;  %v4774_v34 = vstv %s4773_s28 }
 0xa7b   : > { %vm4775_vm4 = vcmp.eq.s32.totalorder %v4774_v34, 1 }
 0xa81   : > { %8442 = vmatpush1.bf16.xpose.msra.mxu0 %v11559_v44 }
 0xa82   : > { %8444 = vmatprep.subr.bf16.mxu0 %v11560_v23 }
 0xa89   : > { %8446 = vmatpush1.bf16.xpose.msra.mxu0 %v11561_v32 }
 0xa8a   : > { %8448 = vmatprep.subr.bf16.mxu0 %v11562_v61 }
 0xa91   : > { %8450 = vmatpush1.bf16.xpose.msra.mxu0 %v11563_v62 }
 0xa92   : > { %8452 = vmatprep.subr.bf16.mxu0 %v11404_v7 }
 0xa98   : > { %4659 = vmatmul.mubr.f32.vlgmr.msra.gmra.mrb[4].mxu0 %v10644_v55 }
 0xa99   : > { %8454 = vmatpush1.bf16.xpose.msra.mxu0 %v11405_v26  ;;  %4761 = vmatprep.mubr.f32.mxu0 %v10625_v16  ;;  %v7514_v16 = vld [vmem:[%s9301_s15 + $0x28] sm:$0xff] }
 0xa9a   : > { %8456 = vmatprep.subr.bf16.mxu0 %v11407_v9  ;;  %v10753_v62 = vand.u32 4294901760, %v7514_v16 }
 0xa9c   : > { %v10756_v61 = vsub.f32 %v7514_v16, %v10753_v62 }
 0xa9e   : > { %v11316_v32 = vand.u32 4294901760, %v10756_v61 }
 0xaa0   : > { %v4885_v23 = vsub.f32 %v10756_v61, %v11316_v32 }
 0xaa1   : > { %8458 = vmatpush1.bf16.xpose.msra.mxu0 %v11408_v24 }
 0xaa2   : > { %8460 = vmatprep.subr.bf16.mxu0 %v11409_v29  ;;  %v4886_v44 = vand.u32 4294901760, %v4885_v23 }
 0xaa4   : > { %4887 = vmatprep.mubr.f32.mxu1 %v4886_v44 }
 0xaa9   : > { %8462 = vmatpush1.bf16.xpose.msra.mxu0 %v11410_v49 }
 0xaaa   : > { %8464 = vmatprep.subr.bf16.mxu0 %v11411_v8 }
 0xab1   : > { %8466 = vmatpush1.bf16.xpose.msra.mxu0 %v11412_v15 }
 0xab2   : > { %8468 = vmatprep.subr.bf16.mxu0 %v11413_v4 }
 0xab9   : > { %8470 = vmatpush1.bf16.xpose.msra.mxu0 %v11414_v19 }
 0xaba   : > { %8472 = vmatprep.subr.bf16.mxu0 %v11415_v14 }
 0xac1   : > { %8474 = vmatpush1.bf16.xpose.msra.mxu0 %v11416_v38 }
 0xac2   : > { %8476 = vmatprep.subr.bf16.mxu0 %v11417_v18 }
 0xac9   : > { %8478 = vmatpush1.bf16.xpose.msra.mxu0 %v11418_v13 }
 0xaca   : > { %8480 = vmatprep.subr.bf16.mxu0 %v11546_v45 }
 0xad1   : > { %8482 = vmatpush1.bf16.xpose.msra.mxu0 %v11547_v2 }
 0xad2   : > { %8676 = vmatprep.subr.bf16.mxu0 %v11404_v7 }
 0xad8   : > { %4763 = vmatmul.mubr.f32.vlgmr.msra.gmra.mrb[4].mxu0 %v10644_v55  ;;  %v11564_v55 = vld [vmem:[#allocation44_spill] sm:$0xff] }
 0xad9   : > { %8678 = vmatpush1.bf16.xpose.msra.mxu0 %v11405_v26 }
 0xada   : > { %8680 = vmatprep.subr.bf16.mxu0 %v11407_v9 }
 0xae1   : > { %8682 = vmatpush1.bf16.xpose.msra.mxu0 %v11408_v24 }
 0xae2   : > { %8684 = vmatprep.subr.bf16.mxu0 %v11409_v29 }
 0xae9   : > { %8686 = vmatpush1.bf16.xpose.msra.mxu0 %v11410_v49 }
 0xaea   : > { %8688 = vmatprep.subr.bf16.mxu0 %v11411_v8 }
 0xaf1   : > { %8690 = vmatpush1.bf16.xpose.msra.mxu0 %v11412_v15 }
 0xaf2   : > { %8692 = vmatprep.subr.bf16.mxu0 %v11413_v4 }
 0xaf9   : > { %8694 = vmatpush1.bf16.xpose.msra.mxu0 %v11414_v19 }
 0xafa   : > { %8696 = vmatprep.subr.bf16.mxu0 %v11415_v14 }
 0xb01   : > { %8698 = vmatpush1.bf16.xpose.msra.mxu0 %v11416_v38 }
 0xb02   : > { %8700 = vmatprep.subr.bf16.mxu0 %v11417_v18 }
 0xb09   : > { %8702 = vmatpush1.bf16.xpose.msra.mxu0 %v11418_v13 }
 0xb0a   : > { %8704 = vmatprep.subr.bf16.mxu0 %v11546_v45 }
 0xb11   : > { %8706 = vmatpush1.bf16.xpose.msra.mxu0 %v11547_v2 }
 0xb12   : > { %8708 = vmatprep.subr.bf16.mxu0 %v11564_v55  ;;  %v11565_v55 = vld [vmem:[#allocation20_spill] sm:$0xff] }
 0xb13   : > { %v4768_v52 = vmul.f32 %v10640_v54, %v11565_v55 }
 0xbab   : > { %v4764_v50 = vpop.f32.mrb[4].mxu0 }
 0xbac   : > { %v4769_v6 = vmul.f32 %v4764_v50, %v10245_v46  ;;  %v4766_v16 = vpop.f32.mrb[5].mxu0 }
 0xbae   : > { %v4770_v43 = vadd.f32 %v4769_v6, %v4768_v52  ;;  %v11573_v6 = vld [vmem:[#allocation9_spill] sm:$0xff]  ;;  %v11574_v52 = vld [vmem:[#allocation12_spill] sm:$0xff] }
 0xbb0   : > { %v10768_v3 = vsel %vm4775_vm4, %v4770_v43, %v10640_v54  ;;  %v11567_v54 = vld [vmem:[#allocation26_spill] sm:$0xff]  ;;  %v11572_v43 = vld [vmem:[#allocation8_spill] sm:$0xff] }
 0xbb1   : > { %v4779_v23 = vadd.f32 %v10384_v47, %v10768_v3  ;;  %v11566_v47 = vand.u32 4294901760, %v10756_v61 }
 0xbb3   : > { %v7515_v44 = vmul.f32 -1.442695, %v4779_v23  ;;  %v11576_v23 = vld [vmem:[#allocation14_spill] sm:$0xff] }
 0xbb5   : > { %9187 = vpow2.f32 %v7515_v44  ;;  %v11577_v44 = vld [vmem:[#allocation15_spill] sm:$0xff] }
 0xbbf   : > { %v9188_v32 = vpop.eup %9187 }
 0xbc0   : > { %v4783_v60 = vadd.f32 1.0, %v9188_v32  ;;  %v11570_v32 = vld [vmem:[#allocation6_spill] sm:$0xff] }
 0xbc2   : > { %9189 = vrcp.f32 %v4783_v60  ;;  %v11569_v60 = vld [vmem:[#allocation5_spill] sm:$0xff] }
 0xbcc   : > { %v9190_v2 = vpop.eup %9189 }
 0xbcd   : > { %v10772_v45 = vand.u32 4294901760, %v9190_v2 }
 0xbcf   : > { %v4889_v55 = vsub.f32 %v9190_v2, %v10772_v45  ;;  %v11568_v2 = vld [vmem:[#allocation43_spill] sm:$0xff] }
 0xbd1   : > { %v4890_v50 = vand.u32 4294901760, %v4889_v55 }
 0xbd3   : > { %v4891_v16 = vsub.f32 %v4889_v55, %v4890_v50 }
 0xbd5   : > { %v4892_v34 = vand.u32 4294901760, %v4891_v16  ;;  %v11578_v16 = vld [vmem:[#allocation16_spill] sm:$0xff] }
 0xbd7   : > { %4893 = vmatmul.mubr.f32.vlgmr.msra.gmra.mrb[4].mxu1 %v4892_v34  ;;  %v11580_v34 = vld [vmem:[#allocation23_spill] sm:$0xff] }
 0xbd8   : > { %8518 = vmatpush1.bf16.xpose.msra.mxu1 %v11478_v51  ;;  %5123 = vmatprep.mubr.f32.mxu1 %v10753_v62 }
 0xbd9   : > { %8520 = vmatprep.subr.bf16.mxu1 %v11479_v28 }
 0xbe0   : > { %8522 = vmatpush1.bf16.xpose.msra.mxu1 %v11480_v40 }
 0xbe1   : > { %8524 = vmatprep.subr.bf16.mxu1 %v11481_v56 }
 0xbe8   : > { %8526 = vmatpush1.bf16.xpose.msra.mxu1 %v11482_v39 }
 0xbe9   : > { %8528 = vmatprep.subr.bf16.mxu1 %v11483_v12 }
 0xbf0   : > { %8530 = vmatpush1.bf16.xpose.msra.mxu1 %v11484_v31 }
 0xbf1   : > { %8532 = vmatprep.subr.bf16.mxu1 %v11485_v10 }
 0xbf8   : > { %8534 = vmatpush1.bf16.xpose.msra.mxu1 %v9984_v25 }
 0xbf9   : > { %8536 = vmatprep.subr.bf16.mxu1 %v11486_v11 }
 0xc00   : > { %8538 = vmatpush1.bf16.xpose.msra.mxu1 %v11487_v57 }
 0xc01   : > { %8540 = vmatprep.subr.bf16.mxu1 %v10014_v22 }
 0xc08   : > { %8542 = vmatpush1.bf16.xpose.msra.mxu1 %v11506_v1 }
 0xc09   : > { %8544 = vmatprep.subr.bf16.mxu1 %v11507_v0 }
 0xc10   : > { %8546 = vmatpush1.bf16.xpose.msra.mxu1 %v11524_v53 }
 0xc11   : > { %8548 = vmatprep.subr.bf16.mxu1 %v11509_v58 }
 0xc17   : > { %5125 = vmatmul.mubr.f32.vlgmr.msra.gmra.mrb[4].mxu1 %v10772_v45 }
 0xc18   : > { %8550 = vmatpush1.bf16.xpose.msra.mxu1 %v11510_v17  ;;  %5260 = vmatprep.mubr.f32.mxu1 %v10756_v61  ;;  %v11571_v61 = vld [vmem:[#allocation7_spill] sm:$0xff] }
 0xc19   : > { %8552 = vmatprep.subr.bf16.mxu1 %v11511_v48 }
 0xc20   : > { %8554 = vmatpush1.bf16.xpose.msra.mxu1 %v11512_v42 }
 0xc21   : > { %8556 = vmatprep.subr.bf16.mxu1 %v11513_v35 }
 0xc28   : > { %8558 = vmatpush1.bf16.xpose.msra.mxu1 %v11494_v5 }
 0xc29   : > { %8560 = vmatprep.subr.bf16.mxu1 %v11495_v59 }
 0xc30   : > { %8562 = vmatpush1.bf16.xpose.msra.mxu1 %v11496_v41 }
 0xc31   : > { %8564 = vmatprep.subr.bf16.mxu1 %v11525_v37 }
 0xc38   : > { %8566 = vmatpush1.bf16.xpose.msra.mxu1 %v11498_v20 }
 0xc39   : > { %8568 = vmatprep.subr.bf16.mxu1 %v11499_v63 }
 0xc40   : > { %8570 = vmatpush1.bf16.xpose.msra.mxu1 %v11500_v21 }
 0xc41   : > { %8572 = vmatprep.subr.bf16.mxu1 %v11501_v36 }
 0xc48   : > { %8574 = vmatpush1.bf16.xpose.msra.mxu1 %v11502_v27 }
 0xc49   : > { %8576 = vmatprep.subr.bf16.mxu1 %v11503_v30 }
 0xc50   : > { %8578 = vmatpush1.bf16.xpose.msra.mxu1 %v11504_v33 }
 0xc51   : > { %8580 = vmatprep.subr.bf16.mxu1 %v11404_v7 }
 0xc57   : > { %5263 = vmatmul.mubr.f32.vlgmr.msra.gmra.mrb[4].mxu1 %v4889_v55  ;;  %v11575_v55 = vld [vmem:[#allocation13_spill] sm:$0xff] }
 0xc58   : > { %8582 = vmatpush1.bf16.xpose.msra.mxu1 %v11405_v26  ;;  %5367 = vmatprep.mubr.f32.mxu1 %v11566_v47  ;;  %v11581_v47 = vld [vmem:[#allocation24_spill] sm:$0xff] }
 0xc59   : > { %8584 = vmatprep.subr.bf16.mxu1 %v11407_v9 }
 0xc60   : > { %8586 = vmatpush1.bf16.xpose.msra.mxu1 %v11408_v24 }
 0xc61   : > { %8588 = vmatprep.subr.bf16.mxu1 %v11409_v29 }
 0xc68   : > { %8590 = vmatpush1.bf16.xpose.msra.mxu1 %v11410_v49 }
 0xc69   : > { %8592 = vmatprep.subr.bf16.mxu1 %v11411_v8 }
 0xc70   : > { %8594 = vmatpush1.bf16.xpose.msra.mxu1 %v11412_v15 }
 0xc71   : > { %8596 = vmatprep.subr.bf16.mxu1 %v11413_v4 }
 0xc78   : > { %8598 = vmatpush1.bf16.xpose.msra.mxu1 %v11414_v19 }
 0xc79   : > { %8600 = vmatprep.subr.bf16.mxu1 %v11415_v14 }
 0xc80   : > { %8602 = vmatpush1.bf16.xpose.msra.mxu1 %v11416_v38 }
 0xc81   : > { %8604 = vmatprep.subr.bf16.mxu1 %v11417_v18 }
 0xc88   : > { %8606 = vmatpush1.bf16.xpose.msra.mxu1 %v11418_v13 }
 0xc89   : > { %8608 = vmatprep.subr.bf16.mxu1 %v11567_v54 }
 0xc90   : > { %8610 = vmatpush1.bf16.xpose.msra.mxu1 %v11568_v2 }
 0xc91   : > { %8612 = vmatprep.subr.bf16.mxu1 %v11569_v60 }
 0xc97   : > { %5371 = vmatmul.mubr.f32.vlgmr.msra.gmra.mrb[4].mxu1 %v4890_v50  ;;  %v11579_v50 = vld [vmem:[#allocation17_spill] sm:$0xff] }
 0xc98   : > { %8614 = vmatpush1.bf16.xpose.msra.mxu1 %v11570_v32  ;;  %5537 = vmatprep.mubr.f32.mxu1 %v10753_v62 }
 0xc99   : > { %8616 = vmatprep.subr.bf16.mxu1 %v11571_v61  ;;  %v11582_v61 = vld [vmem:[#allocation25_spill] sm:$0xff] }
 0xca0   : > { %8618 = vmatpush1.bf16.xpose.msra.mxu1 %v11572_v43  ;;  %v11583_v43 = vld [vmem:[#allocation18_spill] sm:$0xff] }
 0xca1   : > { %8620 = vmatprep.subr.bf16.mxu1 %v11573_v6  ;;  %v11584_v6 = vld [vmem:[#allocation19_spill] sm:$0xff] }
 0xca8   : > { %8622 = vmatpush1.bf16.xpose.msra.mxu1 %v11574_v52 }
 0xca9   : > { %8624 = vmatprep.subr.bf16.mxu1 %v11575_v55 }
 0xcb0   : > { %8626 = vmatpush1.bf16.xpose.msra.mxu1 %v11576_v23 }
 0xcb1   : > { %8628 = vmatprep.subr.bf16.mxu1 %v11577_v44 }
 0xcb8   : > { %8630 = vmatpush1.bf16.xpose.msra.mxu1 %v11578_v16 }
 0xcb9   : > { %8632 = vmatprep.subr.bf16.mxu1 %v11579_v50  ;;  %v5654_v50 = vstv %s5653_s30 }
 0xcba   : > { %vm5655_vm5 = vcmp.eq.s32.totalorder %v5654_v50, 1  ;;  %v11590_v50 = vld [vmem:[#allocation8_spill] sm:$0xff] }
 0xcc0   : > { %8634 = vmatpush1.bf16.xpose.msra.mxu1 %v11580_v34 }
 0xcc1   : > { %8636 = vmatprep.subr.bf16.mxu1 %v11581_v47 }
 0xcc8   : > { %8638 = vmatpush1.bf16.xpose.msra.mxu1 %v11582_v61 }
 0xcc9   : > { %8640 = vmatprep.subr.bf16.mxu1 %v11583_v43 }
 0xcd0   : > { %8642 = vmatpush1.bf16.xpose.msra.mxu1 %v11584_v6 }
 0xcd1   : > { %8644 = vmatprep.subr.bf16.mxu1 %v11404_v7 }
 0xcd7   : > { %5539 = vmatmul.mubr.f32.vlgmr.msra.gmra.mrb[4].mxu1 %v10772_v45 }
 0xcd8   : > { %8646 = vmatpush1.bf16.xpose.msra.mxu1 %v11405_v26  ;;  %5641 = vmatprep.mubr.f32.mxu1 %v10753_v62  ;;  %v7516_v62 = vld [vmem:[%s9301_s15 + $0x30] sm:$0xff] }
 0xcd9   : > { %8648 = vmatprep.subr.bf16.mxu1 %v11407_v9  ;;  %v10881_v6 = vand.u32 4294901760, %v7516_v62 }
 0xcdb   : > { %v10884_v43 = vsub.f32 %v7516_v62, %v10881_v6 }
 0xcdd   : > { %v11319_v61 = vand.u32 4294901760, %v10884_v43 }
 0xcdf   : > { %v5765_v47 = vsub.f32 %v10884_v43, %v11319_v61 }
 0xce0   : > { %8650 = vmatpush1.bf16.xpose.msra.mxu1 %v11408_v24 }
 0xce1   : > { %8652 = vmatprep.subr.bf16.mxu1 %v11409_v29  ;;  %v5766_v34 = vand.u32 4294901760, %v5765_v47 }
 0xce3   : > { %5767 = vmatprep.mubr.f32.mxu0 %v5766_v34  ;;  %v10901_v34 = vld [vmem:[%s11131_s6] ss:$0 sm:$0xff] }
 0xce8   : > { %8654 = vmatpush1.bf16.xpose.msra.mxu1 %v11410_v49 }
 0xce9   : > { %8656 = vmatprep.subr.bf16.mxu1 %v11411_v8 }
 0xcf0   : > { %8658 = vmatpush1.bf16.xpose.msra.mxu1 %v11412_v15 }
 0xcf1   : > { %8660 = vmatprep.subr.bf16.mxu1 %v11413_v4 }
 0xcf8   : > { %8662 = vmatpush1.bf16.xpose.msra.mxu1 %v11414_v19 }
 0xcf9   : > { %8664 = vmatprep.subr.bf16.mxu1 %v11415_v14 }
 0xd00   : > { %8666 = vmatpush1.bf16.xpose.msra.mxu1 %v11416_v38 }
 0xd01   : > { %8668 = vmatprep.subr.bf16.mxu1 %v11417_v18 }
 0xd08   : > { %8670 = vmatpush1.bf16.xpose.msra.mxu1 %v11418_v13 }
 0xd09   : > { %8672 = vmatprep.subr.bf16.mxu1 %v11567_v54 }
 0xd10   : > { %8674 = vmatpush1.bf16.xpose.msra.mxu1 %v11568_v2 }
 0xd11   : > { %8868 = vmatprep.subr.bf16.mxu1 %v11404_v7 }
 0xd17   : > { %5643 = vmatmul.mubr.f32.vlgmr.msra.gmra.mrb[4].mxu1 %v10772_v45  ;;  %v11585_v45 = vld [vmem:[#allocation44_spill] sm:$0xff] }
 0xd18   : > { %8870 = vmatpush1.bf16.xpose.msra.mxu1 %v11405_v26 }
 0xd19   : > { %8872 = vmatprep.subr.bf16.mxu1 %v11407_v9 }
 0xd20   : > { %8874 = vmatpush1.bf16.xpose.msra.mxu1 %v11408_v24 }
 0xd21   : > { %8876 = vmatprep.subr.bf16.mxu1 %v11409_v29 }
 0xd28   : > { %8878 = vmatpush1.bf16.xpose.msra.mxu1 %v11410_v49 }
 0xd29   : > { %8880 = vmatprep.subr.bf16.mxu1 %v11411_v8 }
 0xd30   : > { %8882 = vmatpush1.bf16.xpose.msra.mxu1 %v11412_v15 }
 0xd31   : > { %8884 = vmatprep.subr.bf16.mxu1 %v11413_v4 }
 0xd38   : > { %8886 = vmatpush1.bf16.xpose.msra.mxu1 %v11414_v19 }
 0xd39   : > { %8888 = vmatprep.subr.bf16.mxu1 %v11415_v14 }
 0xd40   : > { %8890 = vmatpush1.bf16.xpose.msra.mxu1 %v11416_v38 }
 0xd41   : > { %8892 = vmatprep.subr.bf16.mxu1 %v11417_v18 }
 0xd48   : > { %8894 = vmatpush1.bf16.xpose.msra.mxu1 %v11418_v13 }
 0xd49   : > { %8896 = vmatprep.subr.bf16.mxu1 %v11567_v54 }
 0xd50   : > { %8898 = vmatpush1.bf16.xpose.msra.mxu1 %v11568_v2 }
 0xd51   : > { %8900 = vmatprep.subr.bf16.mxu1 %v11585_v45  ;;  %v11586_v45 = vld [vmem:[#allocation20_spill] sm:$0xff] }
 0xd52   : > { %v5648_v44 = vmul.f32 %v10768_v3, %v11586_v45 }
 0xdea   : > { %v5644_v16 = vpop.f32.mrb[4].mxu1 }
 0xdeb   : > { %v5649_v23 = vmul.f32 %v5644_v16, %v10245_v46  ;;  %v5646_v62 = vpop.f32.mrb[5].mxu1 }
 0xded   : > { %v5650_v55 = vadd.f32 %v5649_v23, %v5648_v44 }
 0xdef   : > { %v10896_v52 = vsel %vm5655_vm5, %v5650_v55, %v10768_v3 }
 0xdf0   : > { %v5659_v47 = vadd.f32 %v10901_v34, %v10896_v52 }
 0xdf2   : > { %v7517_v61 = vmul.f32 -1.442695, %v5659_v47  ;;  %v11592_v47 = vld [vmem:[#allocation12_spill] sm:$0xff] }
 0xdf4   : > { %9191 = vpow2.f32 %v7517_v61  ;;  %v11588_v61 = vld [vmem:[#allocation6_spill] sm:$0xff] }
 0xdfe   : > { %v9192_v32 = vpop.eup %9191 }
 0xdff   : > { %v5663_v45 = vadd.f32 1.0, %v9192_v32  ;;  %v11587_v32 = vand.u32 4294901760, %v10884_v43 }
 0xe01   : > { %9193 = vrcp.f32 %v5663_v45  ;;  %v11591_v45 = vld [vmem:[#allocation9_spill] sm:$0xff] }
 0xe0b   : > { %v9194_v16 = vpop.eup %9193 }
 0xe0c   : > { %v10905_v62 = vand.u32 4294901760, %v9194_v16 }
 0xe0e   : > { %v5769_v23 = vsub.f32 %v9194_v16, %v10905_v62  ;;  %v11593_v16 = vld [vmem:[#allocation13_spill] sm:$0xff] }
 0xe10   : > { %v5770_v3 = vand.u32 4294901760, %v5769_v23 }
 0xe12   : > { %v5771_v55 = vsub.f32 %v5769_v23, %v5770_v3 }
 0xe14   : > { %v5772_v44 = vand.u32 4294901760, %v5771_v55  ;;  %v11595_v55 = vld [vmem:[#allocation15_spill] sm:$0xff] }
 0xe16   : > { %5773 = vmatmul.mubr.f32.vlgmr.msra.gmra.mrb[6].mxu0 %v5772_v44  ;;  %v11596_v44 = vld [vmem:[#allocation16_spill] sm:$0xff] }
 0xe17   : > { %8710 = vmatpush1.bf16.xpose.msra.mxu0 %v11478_v51  ;;  %6003 = vmatprep.mubr.f32.mxu0 %v10881_v6 }
 0xe18   : > { %8712 = vmatprep.subr.bf16.mxu0 %v11479_v28 }
 0xe1f   : > { %8714 = vmatpush1.bf16.xpose.msra.mxu0 %v11480_v40 }
 0xe20   : > { %8716 = vmatprep.subr.bf16.mxu0 %v11481_v56 }
 0xe27   : > { %8718 = vmatpush1.bf16.xpose.msra.mxu0 %v11482_v39 }
 0xe28   : > { %8720 = vmatprep.subr.bf16.mxu0 %v11483_v12 }
 0xe2f   : > { %8722 = vmatpush1.bf16.xpose.msra.mxu0 %v11484_v31 }
 0xe30   : > { %8724 = vmatprep.subr.bf16.mxu0 %v11485_v10 }
 0xe37   : > { %8726 = vmatpush1.bf16.xpose.msra.mxu0 %v9984_v25 }
 0xe38   : > { %8728 = vmatprep.subr.bf16.mxu0 %v11486_v11 }
 0xe3f   : > { %8730 = vmatpush1.bf16.xpose.msra.mxu0 %v11487_v57 }
 0xe40   : > { %8732 = vmatprep.subr.bf16.mxu0 %v10014_v22 }
 0xe47   : > { %8734 = vmatpush1.bf16.xpose.msra.mxu0 %v11506_v1 }
 0xe48   : > { %8736 = vmatprep.subr.bf16.mxu0 %v11507_v0 }
 0xe4f   : > { %8738 = vmatpush1.bf16.xpose.msra.mxu0 %v11524_v53 }
 0xe50   : > { %8740 = vmatprep.subr.bf16.mxu0 %v11509_v58 }
 0xe56   : > { %6005 = vmatmul.mubr.f32.vlgmr.msra.gmra.mrb[6].mxu0 %v10905_v62 }
 0xe57   : > { %8742 = vmatpush1.bf16.xpose.msra.mxu0 %v11510_v17  ;;  %6140 = vmatprep.mubr.f32.mxu0 %v10884_v43  ;;  %v11589_v43 = vld [vmem:[#allocation7_spill] sm:$0xff] }
 0xe58   : > { %8744 = vmatprep.subr.bf16.mxu0 %v11511_v48 }
 0xe5f   : > { %8746 = vmatpush1.bf16.xpose.msra.mxu0 %v11512_v42 }
 0xe60   : > { %8748 = vmatprep.subr.bf16.mxu0 %v11513_v35 }
 0xe67   : > { %8750 = vmatpush1.bf16.xpose.msra.mxu0 %v11494_v5 }
 0xe68   : > { %8752 = vmatprep.subr.bf16.mxu0 %v11495_v59 }
 0xe6f   : > { %8754 = vmatpush1.bf16.xpose.msra.mxu0 %v11496_v41 }
 0xe70   : > { %8756 = vmatprep.subr.bf16.mxu0 %v11525_v37 }
 0xe77   : > { %8758 = vmatpush1.bf16.xpose.msra.mxu0 %v11498_v20 }
 0xe78   : > { %8760 = vmatprep.subr.bf16.mxu0 %v11499_v63 }
 0xe7f   : > { %8762 = vmatpush1.bf16.xpose.msra.mxu0 %v11500_v21 }
 0xe80   : > { %8764 = vmatprep.subr.bf16.mxu0 %v11501_v36 }
 0xe87   : > { %8766 = vmatpush1.bf16.xpose.msra.mxu0 %v11502_v27 }
 0xe88   : > { %8768 = vmatprep.subr.bf16.mxu0 %v11503_v30 }
 0xe8f   : > { %8770 = vmatpush1.bf16.xpose.msra.mxu0 %v11504_v33 }
 0xe90   : > { %8772 = vmatprep.subr.bf16.mxu0 %v11404_v7 }
 0xe96   : > { %6143 = vmatmul.mubr.f32.vlgmr.msra.gmra.mrb[6].mxu0 %v5769_v23  ;;  %v11594_v23 = vld [vmem:[#allocation14_spill] sm:$0xff] }
 0xe97   : > { %8774 = vmatpush1.bf16.xpose.msra.mxu0 %v11405_v26  ;;  %6247 = vmatprep.mubr.f32.mxu0 %v11587_v32  ;;  %v11598_v32 = vld [vmem:[#allocation23_spill] sm:$0xff] }
 0xe98   : > { %8776 = vmatprep.subr.bf16.mxu0 %v11407_v9 }
 0xe9f   : > { %8778 = vmatpush1.bf16.xpose.msra.mxu0 %v11408_v24 }
 0xea0   : > { %8780 = vmatprep.subr.bf16.mxu0 %v11409_v29 }
 0xea7   : > { %8782 = vmatpush1.bf16.xpose.msra.mxu0 %v11410_v49 }
 0xea8   : > { %8784 = vmatprep.subr.bf16.mxu0 %v11411_v8 }
 0xeaf   : > { %8786 = vmatpush1.bf16.xpose.msra.mxu0 %v11412_v15 }
 0xeb0   : > { %8788 = vmatprep.subr.bf16.mxu0 %v11413_v4 }
 0xeb7   : > { %8790 = vmatpush1.bf16.xpose.msra.mxu0 %v11414_v19 }
 0xeb8   : > { %8792 = vmatprep.subr.bf16.mxu0 %v11415_v14 }
 0xebf   : > { %8794 = vmatpush1.bf16.xpose.msra.mxu0 %v11416_v38 }
 0xec0   : > { %8796 = vmatprep.subr.bf16.mxu0 %v11417_v18 }
 0xec7   : > { %8798 = vmatpush1.bf16.xpose.msra.mxu0 %v11418_v13 }
 0xec8   : > { %8800 = vmatprep.subr.bf16.mxu0 %v11567_v54 }
 0xecf   : > { %8802 = vmatpush1.bf16.xpose.msra.mxu0 %v11568_v2 }
 0xed0   : > { %8804 = vmatprep.subr.bf16.mxu0 %v11569_v60 }
 0xed6   : > { %6251 = vmatmul.mubr.f32.vlgmr.msra.gmra.mrb[6].mxu0 %v5770_v3  ;;  %v11597_v3 = vld [vmem:[#allocation17_spill] sm:$0xff] }
 0xed7   : > { %8806 = vmatpush1.bf16.xpose.msra.mxu0 %v11588_v61  ;;  %6417 = vmatprep.mubr.f32.mxu0 %v10881_v6  ;;  %v11599_v61 = vld [vmem:[#allocation24_spill] sm:$0xff] }
 0xed8   : > { %8808 = vmatprep.subr.bf16.mxu0 %v11589_v43  ;;  %v11600_v43 = vld [vmem:[#allocation25_spill] sm:$0xff] }
 0xedf   : > { %8810 = vmatpush1.bf16.xpose.msra.mxu0 %v11590_v50  ;;  %v11601_v50 = vld [vmem:[#allocation18_spill] sm:$0xff] }
 0xee0   : > { %8812 = vmatprep.subr.bf16.mxu0 %v11591_v45  ;;  %v11602_v45 = vld [vmem:[#allocation19_spill] sm:$0xff] }
 0xee7   : > { %8814 = vmatpush1.bf16.xpose.msra.mxu0 %v11592_v47 }
 0xee8   : > { %8816 = vmatprep.subr.bf16.mxu0 %v11593_v16 }
 0xeef   : > { %8818 = vmatpush1.bf16.xpose.msra.mxu0 %v11594_v23 }
 0xef0   : > { %8820 = vmatprep.subr.bf16.mxu0 %v11595_v55 }
 0xef7   : > { %8822 = vmatpush1.bf16.xpose.msra.mxu0 %v11596_v44 }
 0xef8   : > { %8824 = vmatprep.subr.bf16.mxu0 %v11597_v3  ;;  %v6534_v3 = vstv %s6533_s13 }
 0xef9   : > { %vm6535_vm6 = vcmp.eq.s32.totalorder %v6534_v3, 1 }
 0xeff   : > { %8826 = vmatpush1.bf16.xpose.msra.mxu0 %v11598_v32 }
 0xf00   : > { %8828 = vmatprep.subr.bf16.mxu0 %v11599_v61 }
 0xf07   : > { %8830 = vmatpush1.bf16.xpose.msra.mxu0 %v11600_v43 }
 0xf08   : > { %8832 = vmatprep.subr.bf16.mxu0 %v11601_v50 }
 0xf0f   : > { %8834 = vmatpush1.bf16.xpose.msra.mxu0 %v11602_v45 }
 0xf10   : > { %8836 = vmatprep.subr.bf16.mxu0 %v11404_v7 }
 0xf16   : > { %6419 = vmatmul.mubr.f32.vlgmr.msra.gmra.mrb[6].mxu0 %v10905_v62 }
 0xf17   : > { %8838 = vmatpush1.bf16.xpose.msra.mxu0 %v11405_v26  ;;  %6521 = vmatprep.mubr.f32.mxu0 %v10881_v6  ;;  %v7518_v6 = vld [vmem:[%s9301_s15 + $0x38] sm:$0xff]  ;;  %s7411_s15 = sadd.s32 7, %s9292_s1 }
 0xf18   : > { %8840 = vmatprep.subr.bf16.mxu0 %v11407_v9  ;;  %v10997_v45 = vand.u32 4294901760, %v7518_v6  ;;  %p7412_p13 = scmp.lt.s32.totalorder %s7411_s15, %s9295_s10 }
 0xf1a   : > { %v11000_v50 = vsub.f32 %v7518_v6, %v10997_v45  ;;  %s7413_s14 = scalar_select %p7412_p13, 1, 0 }
 0xf1c   : > { %v11320_v43 = vand.u32 4294901760, %v11000_v50 }
 0xf1e   : > { %v6645_v61 = vsub.f32 %v11000_v50, %v11320_v43 }
 0xf1f   : > { %8842 = vmatpush1.bf16.xpose.msra.mxu0 %v11408_v24 }
 0xf20   : > { %8844 = vmatprep.subr.bf16.mxu0 %v11409_v29  ;;  %v6646_v32 = vand.u32 4294901760, %v6645_v61 }
 0xf22   : > { %6647 = vmatprep.mubr.f32.mxu1 %v6646_v32 }
 0xf27   : > { %8846 = vmatpush1.bf16.xpose.msra.mxu0 %v11410_v49 }
 0xf28   : > { %8848 = vmatprep.subr.bf16.mxu0 %v11411_v8 }
 0xf2f   : > { %8850 = vmatpush1.bf16.xpose.msra.mxu0 %v11412_v15 }
 0xf30   : > { %8852 = vmatprep.subr.bf16.mxu0 %v11413_v4 }
 0xf37   : > { %8854 = vmatpush1.bf16.xpose.msra.mxu0 %v11414_v19 }
 0xf38   : > { %8856 = vmatprep.subr.bf16.mxu0 %v11415_v14 }
 0xf3f   : > { %8858 = vmatpush1.bf16.xpose.msra.mxu0 %v11416_v38 }
 0xf40   : > { %8860 = vmatprep.subr.bf16.mxu0 %v11417_v18 }
 0xf47   : > { %8862 = vmatpush1.bf16.xpose.msra.mxu0 %v11418_v13 }
 0xf48   : > { %8864 = vmatprep.subr.bf16.mxu0 %v11567_v54 }
 0xf4f   : > { %8866 = vmatpush1.bf16.xpose.msra.mxu0 %v11568_v2 }
 0xf56   : > { %6523 = vmatmul.mubr.f32.vlgmr.msra.gmra.mrb[6].mxu0 %v10905_v62  ;;  %v11603_v62 = vld [vmem:[#allocation20_spill] sm:$0xff] }
 0xf57   : > { %v6528_v55 = vmul.f32 %v10896_v52, %v11603_v62 }
0x1029   : > { %v6524_v44 = vpop.f32.mrb[6].mxu0 }
0x102a   : > { %v6529_v23 = vmul.f32 %v6524_v44, %v10245_v46  ;;  %v6526_v6 = vpop.f32.mrb[7].mxu0 }
0x102c   : > { %v6530_v16 = vadd.f32 %v6529_v23, %v6528_v55 }
0x102e   : > { %v11012_v47 = vsel %vm6535_vm6, %v6530_v16, %v10896_v52 }
0x102f   : > { %v6539_v61 = vadd.f32 %v10901_v34, %v11012_v47 }
0x1031   : > { %v7519_v32 = vmul.f32 -1.442695, %v6539_v61 }
0x1033   : > { %9195 = vpow2.f32 %v7519_v32 }
0x103d   : > { %v9196_v43 = vpop.eup %9195 }
0x103e   : > { %v6543_v60 = vadd.f32 1.0, %v9196_v43 }
0x1040   : > { %9197 = vrcp.f32 %v6543_v60 }
0x104a   : > { %v9198_v2 = vpop.eup %9197 }
0x104b   : > { %v11016_v54 = vand.u32 4294901760, %v9198_v2 }
0x104d   : > { %v6649_v62 = vsub.f32 %v9198_v2, %v11016_v54 }
0x104f   : > { %v6650_v44 = vand.u32 4294901760, %v6649_v62 }
0x1051   : > { %v6651_v6 = vsub.f32 %v6649_v62, %v6650_v44 }
0x1053   : > { %v6652_v3 = vand.u32 4294901760, %v6651_v6 }
0x1055   : > { %6653 = vmatmul.mubr.f32.vlgmr.msra.gmra.mrb[6].mxu1 %v6652_v3 }
0x1056   : > { %8902 = vmatpush1.bf16.xpose.msra.mxu1 %v11478_v51  ;;  %6883 = vmatprep.mubr.f32.mxu1 %v10997_v45  ;;  %v11609_v51 = vld [vmem:[#allocation7_spill] sm:$0xff] }
0x1057   : > { %8904 = vmatprep.subr.bf16.mxu1 %v11479_v28  ;;  %v11610_v28 = vld [vmem:[#allocation8_spill] sm:$0xff] }
0x105e   : > { %8906 = vmatpush1.bf16.xpose.msra.mxu1 %v11480_v40  ;;  %v11611_v40 = vld [vmem:[#allocation9_spill] sm:$0xff] }
0x105f   : > { %8908 = vmatprep.subr.bf16.mxu1 %v11481_v56  ;;  %v11612_v56 = vld [vmem:[#allocation12_spill] sm:$0xff] }
0x1066   : > { %8910 = vmatpush1.bf16.xpose.msra.mxu1 %v11482_v39  ;;  %v11613_v39 = vld [vmem:[#allocation13_spill] sm:$0xff] }
0x1067   : > { %8912 = vmatprep.subr.bf16.mxu1 %v11483_v12  ;;  %v11614_v12 = vld [vmem:[#allocation14_spill] sm:$0xff] }
0x106e   : > { %8914 = vmatpush1.bf16.xpose.msra.mxu1 %v11484_v31  ;;  %v11615_v31 = vld [vmem:[#allocation15_spill] sm:$0xff] }
0x106f   : > { %8916 = vmatprep.subr.bf16.mxu1 %v11485_v10  ;;  %v11616_v10 = vld [vmem:[#allocation16_spill] sm:$0xff] }
0x1076   : > { %8918 = vmatpush1.bf16.xpose.msra.mxu1 %v9984_v25  ;;  %v11604_v25 = vand.u32 4294901760, %v11000_v50 }
0x1077   : > { %8920 = vmatprep.subr.bf16.mxu1 %v11486_v11  ;;  %v11617_v11 = vld [vmem:[#allocation17_spill] sm:$0xff] }
0x107e   : > { %8922 = vmatpush1.bf16.xpose.msra.mxu1 %v11487_v57  ;;  %v11618_v57 = vld [vmem:[#allocation23_spill] sm:$0xff] }
0x107f   : > { %8924 = vmatprep.subr.bf16.mxu1 %v10014_v22  ;;  %v11606_v22 = vld [vmem:[#allocation43_spill] sm:$0xff] }
0x1086   : > { %8926 = vmatpush1.bf16.xpose.msra.mxu1 %v11506_v1 }
0x1087   : > { %8928 = vmatprep.subr.bf16.mxu1 %v11507_v0 }
0x108e   : > { %8930 = vmatpush1.bf16.xpose.msra.mxu1 %v11524_v53 }
0x108f   : > { %8932 = vmatprep.subr.bf16.mxu1 %v11509_v58 }
0x1095   : > { %6885 = vmatmul.mubr.f32.vlgmr.msra.gmra.mrb[6].mxu1 %v11016_v54 }
0x1096   : > { %8934 = vmatpush1.bf16.xpose.msra.mxu1 %v11510_v17  ;;  %7020 = vmatprep.mubr.f32.mxu1 %v11000_v50 }
0x1097   : > { %8936 = vmatprep.subr.bf16.mxu1 %v11511_v48 }
0x109e   : > { %8938 = vmatpush1.bf16.xpose.msra.mxu1 %v11512_v42 }
0x109f   : > { %8940 = vmatprep.subr.bf16.mxu1 %v11513_v35 }
0x10a6   : > { %8942 = vmatpush1.bf16.xpose.msra.mxu1 %v11494_v5 }
0x10a7   : > { %8944 = vmatprep.subr.bf16.mxu1 %v11495_v59 }
0x10ae   : > { %8946 = vmatpush1.bf16.xpose.msra.mxu1 %v11496_v41  ;;  %v11608_v41 = vld [vmem:[#allocation6_spill] sm:$0xff] }
0x10af   : > { %8948 = vmatprep.subr.bf16.mxu1 %v11525_v37 }
0x10b6   : > { %8950 = vmatpush1.bf16.xpose.msra.mxu1 %v11498_v20  ;;  %v11619_v20 = vld [vmem:[#allocation24_spill] sm:$0xff] }
0x10b7   : > { %8952 = vmatprep.subr.bf16.mxu1 %v11499_v63  ;;  %v11607_v63 = vld [vmem:[#allocation5_spill] sm:$0xff] }
0x10be   : > { %8954 = vmatpush1.bf16.xpose.msra.mxu1 %v11500_v21  ;;  %v11620_v21 = vld [vmem:[#allocation25_spill] sm:$0xff] }
0x10bf   : > { %8956 = vmatprep.subr.bf16.mxu1 %v11501_v36  ;;  %v11605_v36 = vld [vmem:[#allocation26_spill] sm:$0xff] }
0x10c6   : > { %8958 = vmatpush1.bf16.xpose.msra.mxu1 %v11502_v27  ;;  %v11621_v27 = vld [vmem:[#allocation18_spill] sm:$0xff] }
0x10c7   : > { %8960 = vmatprep.subr.bf16.mxu1 %v11503_v30  ;;  %v11622_v30 = vld [vmem:[#allocation19_spill] sm:$0xff] }
0x10ce   : > { %8962 = vmatpush1.bf16.xpose.msra.mxu1 %v11504_v33 }
0x10cf   : > { %8964 = vmatprep.subr.bf16.mxu1 %v11404_v7 }
0x10d5   : > { %7023 = vmatmul.mubr.f32.vlgmr.msra.gmra.mrb[6].mxu1 %v6649_v62 }
0x10d6   : > { %8966 = vmatpush1.bf16.xpose.msra.mxu1 %v11405_v26  ;;  %7127 = vmatprep.mubr.f32.mxu1 %v11604_v25 }
0x10d7   : > { %8968 = vmatprep.subr.bf16.mxu1 %v11407_v9 }
0x10de   : > { %8970 = vmatpush1.bf16.xpose.msra.mxu1 %v11408_v24 }
0x10df   : > { %8972 = vmatprep.subr.bf16.mxu1 %v11409_v29 }
0x10e6   : > { %8974 = vmatpush1.bf16.xpose.msra.mxu1 %v11410_v49 }
0x10e7   : > { %8976 = vmatprep.subr.bf16.mxu1 %v11411_v8 }
0x10ee   : > { %8978 = vmatpush1.bf16.xpose.msra.mxu1 %v11412_v15 }
0x10ef   : > { %8980 = vmatprep.subr.bf16.mxu1 %v11413_v4 }
0x10f6   : > { %8982 = vmatpush1.bf16.xpose.msra.mxu1 %v11414_v19 }
0x10f7   : > { %8984 = vmatprep.subr.bf16.mxu1 %v11415_v14 }
0x10fe   : > { %8986 = vmatpush1.bf16.xpose.msra.mxu1 %v11416_v38 }
0x10ff   : > { %8988 = vmatprep.subr.bf16.mxu1 %v11417_v18 }
0x1106   : > { %8990 = vmatpush1.bf16.xpose.msra.mxu1 %v11418_v13 }
0x1107   : > { %8992 = vmatprep.subr.bf16.mxu1 %v11605_v36 }
0x110e   : > { %8994 = vmatpush1.bf16.xpose.msra.mxu1 %v11606_v22 }
0x110f   : > { %8996 = vmatprep.subr.bf16.mxu1 %v11607_v63 }
0x1115   : > { %7131 = vmatmul.mubr.f32.vlgmr.msra.gmra.mrb[6].mxu1 %v6650_v44 }
0x1116   : > { %8998 = vmatpush1.bf16.xpose.msra.mxu1 %v11608_v41  ;;  %7297 = vmatprep.mubr.f32.mxu1 %v10997_v45 }
0x1117   : > { %9000 = vmatprep.subr.bf16.mxu1 %v11609_v51 }
0x111e   : > { %9002 = vmatpush1.bf16.xpose.msra.mxu1 %v11610_v28 }
0x111f   : > { %9004 = vmatprep.subr.bf16.mxu1 %v11611_v40 }
0x1126   : > { %9006 = vmatpush1.bf16.xpose.msra.mxu1 %v11612_v56 }
0x1127   : > { %9008 = vmatprep.subr.bf16.mxu1 %v11613_v39 }
0x112e   : > { %9010 = vmatpush1.bf16.xpose.msra.mxu1 %v11614_v12 }
0x112f   : > { %9012 = vmatprep.subr.bf16.mxu1 %v11615_v31 }
0x1136   : > { %9014 = vmatpush1.bf16.xpose.msra.mxu1 %v11616_v10 }
0x1137   : > { %9016 = vmatprep.subr.bf16.mxu1 %v11617_v11 }
0x113e   : > { %9018 = vmatpush1.bf16.xpose.msra.mxu1 %v11618_v57 }
0x113f   : > { %9020 = vmatprep.subr.bf16.mxu1 %v11619_v20 }
0x1146   : > { %9022 = vmatpush1.bf16.xpose.msra.mxu1 %v11620_v21 }
0x1147   : > { %9024 = vmatprep.subr.bf16.mxu1 %v11621_v27 }
0x114e   : > { %9026 = vmatpush1.bf16.xpose.msra.mxu1 %v11622_v30 }
0x114f   : > { %9028 = vmatprep.subr.bf16.mxu1 %v11404_v7 }
0x1155   : > { %7299 = vmatmul.mubr.f32.vlgmr.msra.gmra.mrb[6].mxu1 %v11016_v54 }
0x1156   : > { %9030 = vmatpush1.bf16.xpose.msra.mxu1 %v11405_v26  ;;  %7401 = vmatprep.mubr.f32.mxu1 %v10997_v45 }
0x1157   : > { %9032 = vmatprep.subr.bf16.mxu1 %v11407_v9 }
0x115e   : > { %9034 = vmatpush1.bf16.xpose.msra.mxu1 %v11408_v24 }
0x115f   : > { %9036 = vmatprep.subr.bf16.mxu1 %v11409_v29 }
0x1166   : > { %9038 = vmatpush1.bf16.xpose.msra.mxu1 %v11410_v49 }
0x1167   : > { %9040 = vmatprep.subr.bf16.mxu1 %v11411_v8 }
0x116e   : > { %9042 = vmatpush1.bf16.xpose.msra.mxu1 %v11412_v15 }
0x116f   : > { %9044 = vmatprep.subr.bf16.mxu1 %v11413_v4  ;;  %v7414_v4 = vstv %s7413_s14 }
0x1170   : > { %vm7415_vm7 = vcmp.eq.s32.totalorder %v7414_v4, 1 }
0x1176   : > { %9046 = vmatpush1.bf16.xpose.msra.mxu1 %v11414_v19  ;;  %v11623_v19 = vld [vmem:[#allocation20_spill] sm:$0xff] }
0x1177   : > { %9048 = vmatprep.subr.bf16.mxu1 %v11415_v14  ;;  %v7408_v14 = vmul.f32 %v11012_v47, %v11623_v19 }
0x117e   : > { %9050 = vmatpush1.bf16.xpose.msra.mxu1 %v11416_v38 }
0x117f   : > { %9052 = vmatprep.subr.bf16.mxu1 %v11417_v18 }
0x1186   : > { %9054 = vmatpush1.bf16.xpose.msra.mxu1 %v11418_v13 }
0x1187   : > { %9056 = vmatprep.subr.bf16.mxu1 %v11605_v36 }
0x118e   : > { %9058 = vmatpush1.bf16.xpose.msra.mxu1 %v11606_v22 }
0x1195   : > { %7403 = vmatmul.mubr.f32.vlgmr.msra.gmra.mrb[6].mxu1 %v11016_v54 }
0x1268   : > { %v7404_v7 = vpop.f32.mrb[6].mxu1 }
0x1269   : > { %v7409_v26 = vmul.f32 %v7404_v7, %v10245_v46  ;;  %v7406_v9 = vpop.f32.mrb[7].mxu1 }
0x126b   : > { %v7410_v24 = vadd.f32 %v7409_v26, %v7408_v14 }
0x126d   : > { %v7416_v13 = vsel %vm7415_vm7, %v7410_v24, %v11012_v47 }
0x126e   : > { %7417 = vst [vmem:[%s11132_s7] sm:$0xff] %v7416_v13 }
0x126f PF: > { %s20_s9 = sadd.s32 1, %s9223_s9   ;;  %s11624_s30 = smov %s9219_s8 }
0x1270   : > { %p17_p0 = scmp.ge.s32.totalorder %s20_s9, 4   ;;  %s11625_s8 = smov %s11627_s0 }
0x1272   :  { %19 = sbr.rel (!%p17_p0) target bundleno = 4 (0x4), region = 92 }

</bundles_post_ra>
